<compile_context>
chip_gen: v6e
topology: v6e:2x2x1
jax: 0.10.0
libtpu: 0.0.40
codegen_flags: <defaults>
</compile_context>

<pallas_src>
import functools
import math

import jax
import jax.numpy as jnp
from jax.experimental import pallas as pl
from jax.experimental.pallas import tpu as pltpu

# ----------------------------- model config -----------------------------
NUM_HIDDENS = 8
NUM_HEADS = 4
NUM_GROUPS = 2
QUERY_SIZE = 6
KEY_SIZE = 6
VALUE_SIZE = 6
BATCH_SIZE = 2
NUM_QUERIES = 4
NUM_KEYS = 4


def _roundup(x, m):
    return (x + m - 1) // m * m


# ------------------------------- kernel ---------------------------------
def gqa_kernel(x_ref, w_ref, mask_ref, o_ref, *,
               scale, num_groups, c, wy, mp, kp, k_off, v_off, wo_off, bo_off):
    # 1) All three input projections (+ biases) in ONE MXU push.  The data slab
    #    is block-diagonal over {q-g0, q-g1, k, v} with a homogeneous 1s column
    #    per block, so x @ W1 yields group-stacked queries, kh and vh in disjoint
    #    row blocks of `y` (useful values live in output columns [0, hd)).
    w1 = w_ref[0:c, :]                                                 # (C, WY)
    y = jnp.dot(x_ref[...], w1, preferred_element_type=jnp.float32)   # (R, WY)

    qs = y[0:k_off, :]                       # (G*Mp, WY) group-stacked queries
    kh = y[k_off:k_off + kp, :]              # (Kp, WY)
    vh = y[v_off:v_off + kp, :]              # (Kp, WY)

    # 2) One score matmul for all groups.  Contract the full padded feature axis
    #    (zero padding contributes nothing) -> no lane slicing, no transpose.
    scores = jax.lax.dot_general(qs, kh, (((1,), (1,)), ((), ())),
                                 preferred_element_type=jnp.float32) * scale
    scores = scores + mask_ref[...]          # precomputed additive block-diag mask
    scores = scores - jnp.max(scores, axis=-1, keepdims=True)
    p = jnp.exp(scores)
    p = p / jnp.sum(p, axis=-1, keepdims=True)   # exact normalization (feedback)

    # 3) One PV matmul for all groups.
    ctx = jnp.dot(p, vh, preferred_element_type=jnp.float32)          # (G*Mp, WY)

    # 4) Output projection.  merge() + the share() repetition are folded into the
    #    per-group wo blocks; the group merge is a static sum of G sublane-aligned
    #    matmuls.  bo arrives pre-broadcast to Mp rows (lane-dense add).
    out = w_ref[bo_off:bo_off + mp, :]                                 # (Mp, HP)
    for gi in range(num_groups):
        out = out + jnp.dot(ctx[gi * mp:(gi + 1) * mp, :],
                            w_ref[wo_off + gi * wy:wo_off + (gi + 1) * wy, :],
                            preferred_element_type=jnp.float32)
    o_ref[...] = out.astype(o_ref.dtype)


# ------------------------------ wrapper ----------------------------------
def group_query_attention(q, k, v, params, *, num_groups, num_heads):
    B, Nq, Dq = q.shape
    _, Nk, Dk = k.shape
    _, _, Dv = v.shape
    H = params["wq"].shape[1]
    G = num_groups
    hd = H // num_heads
    rep = num_heads // G
    scale = 1.0 / math.sqrt(H // G)      # DotAttention scales by sqrt(per-group query width)
    f32 = jnp.float32

    # ---- one-off weight folding: absorb the share()/merge() repetition ----
    #   scores_g = qg @ tile(kh, rep)^T == (sum of qg's rep hd-chunks) @ kh^T
    #   merge(attn @ tile(vh, rep)) @ w_o == sum_g (attn_g @ vh) @ wo_f_g
    wq_f = params["wq"].reshape(Dq, G, rep, hd).sum(axis=2)   # (Dq, G, hd)
    bq_f = params["bq"].reshape(G, rep, hd).sum(axis=1)       # (G, hd)
    wo_f = params["wo"].reshape(G, rep, hd, H).sum(axis=1)    # (G, hd, H)

    # ---- padded geometry ----
    M, K = B * Nq, B * Nk
    Mp, Kp = _roundup(M, 8), _roundup(K, 8)
    Dqp, Dkp, Dvp = _roundup(Dq + 1, 8), _roundup(Dk + 1, 8), _roundup(Dv + 1, 8)
    C = G * Dqp + Dkp + Dvp              # data-slab width (features + homogeneous 1s)
    R = G * Mp + 2 * Kp                  # data-slab rows
    WY = 128                             # lane-dense projection width (cols >= hd are 0)
    HP = 128                             # lane-dense output width   (cols >= H are 0)
    k_off, v_off = G * Mp, G * Mp + Kp
    wo_off, bo_off = C, C + G * WY
    assert hd <= WY and H <= HP

    # ---- slab 1: packed block-diagonal data (q per group, k, v) ----
    q2, k2, v2 = q.reshape(M, Dq), k.reshape(K, Dk), v.reshape(K, Dv)
    x = jnp.zeros((R, C), f32)
    for gi in range(G):
        x = x.at[gi * Mp:gi * Mp + M, gi * Dqp:gi * Dqp + Dq].set(q2)
        x = x.at[gi * Mp:gi * Mp + M, gi * Dqp + Dq].set(1.0)        # homogeneous col
    x = x.at[k_off:k_off + K, G * Dqp:G * Dqp + Dk].set(k2)
    x = x.at[k_off:k_off + K, G * Dqp + Dk].set(1.0)
    x = x.at[v_off:v_off + K, G * Dqp + Dkp:G * Dqp + Dkp + Dv].set(v2)
    x = x.at[v_off:v_off + K, G * Dqp + Dkp + Dv].set(1.0)

    # ---- slab 2: packed weights [W1 ; wo_g0 ; wo_g1 ; bo rows] ----
    w1 = jnp.zeros((C, WY), f32)
    for gi in range(G):
        w1 = w1.at[gi * Dqp:gi * Dqp + Dq, 0:hd].set(wq_f[:, gi, :])
        w1 = w1.at[gi * Dqp + Dq, 0:hd].set(bq_f[gi])
    w1 = w1.at[G * Dqp:G * Dqp + Dk, 0:hd].set(params["wk"])
    w1 = w1.at[G * Dqp + Dk, 0:hd].set(params["bk"][0])
    w1 = w1.at[G * Dqp + Dkp:G * Dqp + Dkp + Dv, 0:hd].set(params["wv"])
    w1 = w1.at[G * Dqp + Dkp + Dv, 0:hd].set(params["bv"][0])

    wo_blocks = [jnp.zeros((WY, HP), f32).at[0:hd, 0:H].set(wo_f[gi]) for gi in range(G)]
    bo_rows = jnp.zeros((Mp, HP), f32).at[:, 0:H].set(jnp.broadcast_to(params["bo"], (Mp, H)))
    w = jnp.concatenate([w1] + wo_blocks + [bo_rows], axis=0)        # (C + G*WY + Mp, 128)

    # ---- slab 3: precomputed additive block-diagonal batch mask ----
    row_b = jnp.concatenate([jnp.repeat(jnp.arange(B, dtype=jnp.int32), Nq),
                             jnp.full((Mp - M,), -1, jnp.int32)])
    row_b = jnp.tile(row_b, (G,))                                     # (G*Mp,)
    col_b = jnp.concatenate([jnp.repeat(jnp.arange(B, dtype=jnp.int32), Nk),
                             jnp.full((Kp - K,), -2, jnp.int32)])     # (Kp,)
    mask = jnp.where(row_b[:, None] == col_b[None, :], 0.0, -1e30).astype(f32)

    kernel = functools.partial(
        gqa_kernel, scale=scale, num_groups=G, c=C, wy=WY, mp=Mp, kp=Kp,
        k_off=k_off, v_off=v_off, wo_off=wo_off, bo_off=bo_off)

    vmem = lambda: pl.BlockSpec(memory_space=pltpu.MemorySpace.VMEM)
    out_p = pl.pallas_call(
        kernel,
        out_shape=jax.ShapeDtypeStruct((Mp, HP), f32),
        in_specs=[vmem(), vmem(), vmem()],
        out_specs=vmem(),
    )(x, w, mask)
    return out_p[:M, :H].reshape(B, Nq, H)


# --------------------------- pure-JAX reference ---------------------------
def reference(q, k, v, params, num_groups, num_heads):
    B, Nq, _ = q.shape
    qh = q @ params["wq"] + params["bq"]
    kh = k @ params["wk"] + params["bk"]
    vh = v @ params["wv"] + params["bv"]
    qs = qh.reshape(B, Nq, num_groups, -1).transpose(0, 2, 1, 3)
    qs = qs.reshape(B * num_groups, Nq, -1)

    def share(X):
        Bx, Nx, Dx = X.shape
        X = jnp.broadcast_to(X[:, None], (Bx, num_groups, Nx, Dx))
        X = X.reshape(Bx * num_groups, Nx, Dx)
        return jnp.tile(X, (1, 1, num_heads // num_groups))

    ks, vs = share(kh), share(vh)
    d = qs.shape[-1]
    scores = jnp.einsum("bqd,bkd->bqk", qs, ks) / math.sqrt(d)
    attn = jax.nn.softmax(scores, axis=-1)
    r = jnp.einsum("bqk,bkd->bqd", attn, vs)
    r = r.reshape(B, num_groups, Nq, -1).transpose(0, 2, 1, 3).reshape(B, Nq, -1)
    return r @ params["wo"] + params["bo"]


# --------------------------------- main -----------------------------------
if __name__ == "__main__":
    # Full-precision reference matmuls so the kernel/reference comparison is not
    # dominated by XLA's default bf16-pass f32 matmul rounding.
    jax.config.update("jax_default_matmul_precision", "highest")

    key = jax.random.PRNGKey(0)
    ks = jax.random.split(key, 11)
    hd = NUM_HIDDENS // NUM_HEADS

    def init_linear(kw, kb, fan_in, fan_out):
        bound = 1.0 / math.sqrt(fan_in)  # torch.nn.Linear default init scheme
        w = jax.random.uniform(kw, (fan_in, fan_out), jnp.float32, -bound, bound)
        b = jax.random.uniform(kb, (1, fan_out), jnp.float32, -bound, bound)
        return w, b

    wq, bq = init_linear(ks[0], ks[1], QUERY_SIZE, NUM_HIDDENS)
    wk, bk = init_linear(ks[2], ks[3], KEY_SIZE, hd)
    wv, bv = init_linear(ks[4], ks[5], VALUE_SIZE, hd)
    wo, bo = init_linear(ks[6], ks[7], NUM_HIDDENS, NUM_HIDDENS)
    params = dict(wq=wq, bq=bq, wk=wk, bk=bk, wv=wv, bv=bv, wo=wo, bo=bo)

    q = jax.random.uniform(ks[8], (BATCH_SIZE, NUM_QUERIES, QUERY_SIZE), jnp.float32)
    k = jax.random.uniform(ks[9], (BATCH_SIZE, NUM_KEYS, KEY_SIZE), jnp.float32)
    v = jax.random.uniform(ks[10], (BATCH_SIZE, NUM_KEYS, VALUE_SIZE), jnp.float32)

    out = group_query_attention(q, k, v, params,
                                num_groups=NUM_GROUPS, num_heads=NUM_HEADS)
    out = jax.block_until_ready(out)

    ref = reference(q, k, v, params, NUM_GROUPS, NUM_HEADS)
    assert out.shape == (BATCH_SIZE, NUM_QUERIES, NUM_HIDDENS)
    # Exact softmax normalization restored -> tolerance tightened from 1e-2 to
    # 1e-4 (slack covers MXU f32 pass-splitting vs XLA reference rounding).
    assert jnp.allclose(out, ref, atol=1e-4, rtol=1e-4), "mismatch vs JAX reference"

    print("KERNEL_OK")
</pallas_src>

<mosaic_0001>
module attributes {stable_mosaic.version = 11 : i64} {
  func.func @gqa_kernel(%arg0: memref<32x32xf32, #tpu.memory_space<vmem>>, %arg1: memref<296x128xf32, #tpu.memory_space<vmem>>, %arg2: memref<16x8xf32, #tpu.memory_space<vmem>>, %arg3: memref<8x128xf32, #tpu.memory_space<vmem>>) attributes {dimension_semantics = [], scalar_prefetch = 0 : i64, scratch_operands = 0 : i64, tpu.core_type = #tpu.core_type<tc>} {
    %c0 = arith.constant 0 : index
    %c0_0 = arith.constant 0 : index
    %0 = vector.load %arg1[%c0, %c0_0] : memref<296x128xf32, #tpu.memory_space<vmem>>, vector<32x128xf32>
    %c0_1 = arith.constant 0 : index
    %c0_2 = arith.constant 0 : index
    %1 = vector.load %arg0[%c0_1, %c0_2] : memref<32x32xf32, #tpu.memory_space<vmem>>, vector<32x32xf32>
    %cst = arith.constant dense<0.000000e+00> : vector<32x128xf32>
    %2 = tpu.matmul %1, %0, %cst {dimension_numbers = #tpu.dot_dimension_numbers<[1], [0], [0], [1], [0, 0, 1, 1], [], []>, precision = #tpu.contract_precision<fp32>} : vector<32x32xf32>, vector<32x128xf32>, vector<32x128xf32> -> vector<32x128xf32>
    %3 = vector.extract_strided_slice %2 {offsets = [0, 0], sizes = [16, 128], strides = [1, 1]} : vector<32x128xf32> to vector<16x128xf32>
    %4 = vector.extract_strided_slice %2 {offsets = [16, 0], sizes = [8, 128], strides = [1, 1]} : vector<32x128xf32> to vector<8x128xf32>
    %5 = vector.extract_strided_slice %2 {offsets = [24, 0], sizes = [8, 128], strides = [1, 1]} : vector<32x128xf32> to vector<8x128xf32>
    %cst_3 = arith.constant dense<0.000000e+00> : vector<16x8xf32>
    %6 = tpu.matmul %3, %4, %cst_3 {dimension_numbers = #tpu.dot_dimension_numbers<[1], [1], [0], [0], [0, 0, 1, 0], [], []>, precision = #tpu.contract_precision<fp32>} : vector<16x128xf32>, vector<8x128xf32>, vector<16x8xf32> -> vector<16x8xf32>
    %cst_4 = arith.constant 5.000000e-01 : f32
    %7 = vector.broadcast %cst_4 : f32 to vector<16x8xf32>
    %8 = arith.mulf %6, %7 : vector<16x8xf32>
    %c0_5 = arith.constant 0 : index
    %c0_6 = arith.constant 0 : index
    %9 = vector.load %arg2[%c0_5, %c0_6] : memref<16x8xf32, #tpu.memory_space<vmem>>, vector<16x8xf32>
    %10 = arith.addf %8, %9 : vector<16x8xf32>
    %cst_7 = arith.constant dense<0xFF800000> : vector<16xf32>
    %11 = vector.multi_reduction <maximumf>, %10, %cst_7 [1] : vector<16x8xf32> to vector<16xf32>
    %12 = vector.shape_cast %11 : vector<16xf32> to vector<16x1xf32>
    %13 = vector.broadcast %12 : vector<16x1xf32> to vector<16x8xf32>
    %14 = arith.subf %10, %13 : vector<16x8xf32>
    %15 = math.exp %14 : vector<16x8xf32>
    %cst_8 = arith.constant dense<0.000000e+00> : vector<16xf32>
    %16 = vector.multi_reduction <add>, %15, %cst_8 [1] : vector<16x8xf32> to vector<16xf32>
    %17 = vector.shape_cast %16 : vector<16xf32> to vector<16x1xf32>
    %18 = vector.broadcast %17 : vector<16x1xf32> to vector<16x8xf32>
    %19 = arith.divf %15, %18 : vector<16x8xf32>
    %cst_9 = arith.constant dense<0.000000e+00> : vector<16x128xf32>
    %20 = tpu.matmul %19, %5, %cst_9 {dimension_numbers = #tpu.dot_dimension_numbers<[1], [0], [0], [1], [0, 0, 1, 1], [], []>, precision = #tpu.contract_precision<fp32>} : vector<16x8xf32>, vector<8x128xf32>, vector<16x128xf32> -> vector<16x128xf32>
    %c288 = arith.constant 288 : index
    %c0_10 = arith.constant 0 : index
    %21 = vector.load %arg1[%c288, %c0_10] : memref<296x128xf32, #tpu.memory_space<vmem>>, vector<8x128xf32>
    %22 = vector.extract_strided_slice %20 {offsets = [0, 0], sizes = [8, 128], strides = [1, 1]} : vector<16x128xf32> to vector<8x128xf32>
    %c32 = arith.constant 32 : index
    %c0_11 = arith.constant 0 : index
    %23 = vector.load %arg1[%c32, %c0_11] : memref<296x128xf32, #tpu.memory_space<vmem>>, vector<128x128xf32>
    %cst_12 = arith.constant dense<0.000000e+00> : vector<8x128xf32>
    %24 = tpu.matmul %22, %23, %cst_12 {dimension_numbers = #tpu.dot_dimension_numbers<[1], [0], [0], [1], [0, 0, 1, 1], [], []>, precision = #tpu.contract_precision<fp32>} : vector<8x128xf32>, vector<128x128xf32>, vector<8x128xf32> -> vector<8x128xf32>
    %25 = arith.addf %21, %24 : vector<8x128xf32>
    %26 = vector.extract_strided_slice %20 {offsets = [8, 0], sizes = [8, 128], strides = [1, 1]} : vector<16x128xf32> to vector<8x128xf32>
    %c160 = arith.constant 160 : index
    %c0_13 = arith.constant 0 : index
    %27 = vector.load %arg1[%c160, %c0_13] : memref<296x128xf32, #tpu.memory_space<vmem>>, vector<128x128xf32>
    %cst_14 = arith.constant dense<0.000000e+00> : vector<8x128xf32>
    %28 = tpu.matmul %26, %27, %cst_14 {dimension_numbers = #tpu.dot_dimension_numbers<[1], [0], [0], [1], [0, 0, 1, 1], [], []>, precision = #tpu.contract_precision<fp32>} : vector<8x128xf32>, vector<128x128xf32>, vector<8x128xf32> -> vector<8x128xf32>
    %29 = arith.addf %25, %28 : vector<8x128xf32>
    %c0_15 = arith.constant 0 : index
    %c0_16 = arith.constant 0 : index
    %30 = vector.load %arg3[%c0_15, %c0_16] : memref<8x128xf32, #tpu.memory_space<vmem>>, vector<8x128xf32>
    tpu.vector_store %arg3[%c0_15, %c0_16], %29 {strides = array<i32>} : memref<8x128xf32, #tpu.memory_space<vmem>>, vector<8x128xf32>,
    return
  }
}

</mosaic_0001>

<bundles_post_ra>
// kernel: tpu_custom_call.1
= control target key start
LH: loop header
LB: loop body
LE: loop exit
PB: predicated region body
PF: predicated region fallthrough
CT: control target
= control target key end

     0   :  { %8 = vsyncpa [#allocation3], 0  ;;  %s4864_s0 = inlined_call_operand.hbm [shape: f32[32,32], index: 0, kind: input, shape index: {}]   ;;  %s4865_s1 = inlined_call_operand.hbm [shape: f32[296,128], index: 1, kind: input, shape index: {}]   ;;  %s4866_s2 = inlined_call_operand.vmem [shape: f32[16,8], index: 2, kind: input, shape index: {}]   ;;  %s4867_s3 = inlined_call_operand.hbm [shape: f32[8,128], index: 3, kind: output, shape index: {}]  }
   0x1   :  { %9 = vsyncpa [#allocation6], 0 }
   0x2   :  { %10 = vsyncpa [#allocation4], 0  ;;  %s3958_s12 = smov [#allocation2]  }
   0x3   :  { %s16_s13 = sshll.u32 %s3958_s12, 4  ;;  %s17_s13 = int_to_ptr.vmem [resolvable:$true] %s16_s13 }
   0x4   :  { %s3900_s14 = scalar_lea.vmem %s17_s13, 512  ;;  %p3905_p1 = scmp.lt.s32.totalorder %s17_s13, %s17_s13 }
   0x5   :  { %p3901_p0 = scmp.ne.s32.totalorder %s17_s13, %s3900_s14  ;;  %p3906_p2 = scmp.lt.s32.totalorder %s3900_s14, %s3900_s14 }
   0x7   :  { %p3907_p3 = por %p3906_p2, %p3905_p1 }
   0x9   :  { %p3908_p4 = pnand %p3907_p3, %p3901_p0 }
   0xb   :  { %3911 = shalt.err (!%p3908_p4)
}
   0xc   :  { %s3959_s15 = smov 128   ;;  %s3960_s16 = smov 8  }
   0xd   :  { %22 = dma.hbm_to_vmem [thread:$0]  %s4864_s0, 512, %s17_s13, [#allocation3], %s3959_s15, %s3959_s15, %s3960_s16  }
   0xe   :  { %s3961_s19 = smov [#allocation5]  }
   0xf   :  { %s28_s20 = sshll.u32 %s3961_s19, 4  ;;  %s29_s20 = int_to_ptr.vmem [resolvable:$true] %s28_s20 }
  0x10   :  { %s3920_s21 = scalar_lea.vmem %s29_s20, 4736  ;;  %p3925_p6 = scmp.lt.s32.totalorder %s29_s20, %s29_s20 }
  0x11   :  { %p3921_p5 = scmp.ne.s32.totalorder %s29_s20, %s3920_s21  ;;  %p3926_p7 = scmp.lt.s32.totalorder %s3920_s21, %s3920_s21 }
  0x13   :  { %p3927_p8 = por %p3926_p7, %p3925_p6 }
  0x15   :  { %p3928_p9 = pnand %p3927_p8, %p3921_p5 }
  0x17   :  { %3931 = shalt.err (!%p3928_p9)
}
  0x18   :  { %34 = dma.hbm_to_vmem [thread:$0]  %s4865_s1, 4736, %s29_s20, [#allocation6], %s3959_s15, %s3959_s15, %s3960_s16  }
  0x19   :  { %3952 = dma.done.wait [#allocation3], 512  }
  0x1a   :  { %3953 = vsyncadd [#allocation3], 4294966784 }
  0x1b   :  { %3954 = dma.done.wait [#allocation6], 4736  }
  0x1c   :  { %3955 = vsyncadd [#allocation6], 4294962560  ;;  %vm51_vm0 = vcmask 261120   ;;  %v46_v0 = vld [vmem:[#allocation5 + $0x18] sm:$0xff]  ;;  %v45_v1 = vld [vmem:[#allocation5 + $0x10] sm:$0xff]  ;;  %vm1173_vm1 = vcmask 64512  }
  0x1d   :  { %v44_v2 = vld [vmem:[#allocation5 + $0x8] sm:$0xff]  ;;  %v3991_v3 = vand.u32 4294901760, %v46_v0  ;;  %v3993_v4 = vand.u32 4294901760, %v45_v1  ;;  %v43_v6 = vld [vmem:[#allocation5] sm:$0xff]  ;;  %v49_v12 = vld [vmem:[#allocation2 + $0x10] sm:$0xff]  ;;  %vm3963_vm2 = vmmov 0  }
  0x1e   :  { %v3995_v5 = vand.u32 4294901760, %v44_v2  ;;  %v47_v7 = vld [vmem:[#allocation2] sm:$0xff]  ;;  %v48_v8 = vld [vmem:[#allocation2 + $0x8] sm:$0xff]  ;;  %v3997_v9 = vand.u32 4294901760, %v43_v6  ;;  %v50_v13 = vld [vmem:[#allocation2 + $0x18] sm:$0xff]  ;;  %v59_v19 = vsel %vm51_vm0, %v49_v12, 0 }
  0x1f   :  { %v53_v10 = vsel %vm51_vm0, %v47_v7, 0  ;;  %v56_v11 = vsel %vm51_vm0, %v48_v8, 0  ;;  %3313 = vmatprep.subr.mxu0 %v3991_v3  ;;  %v199_v14 = vsub.f32 %v46_v0, %v3991_v3  ;;  %v206_v17 = vsub.f32 %v45_v1, %v3993_v4 }
  0x20   :  { %v4003_v15 = vand.u32 4294901760, %v53_v10  ;;  %v4005_v16 = vand.u32 4294901760, %v56_v11  ;;  %3314 = vmatpush3.msra.mxu0 %v3991_v3  ;;  %v213_v18 = vsub.f32 %v44_v2, %v3995_v5  ;;  %v62_v20 = vsel %vm51_vm0, %v50_v13, 0 }
  0x21   :  { %v220_v21 = vsub.f32 %v43_v6, %v3997_v9  ;;  %3315 = vmatprep.subr.mxu0 %v3993_v4  ;;  %v4014_v22 = vand.u32 4294901760, %v199_v14  ;;  %v4022_v25 = vand.u32 4294901760, %v206_v17  ;;  %v4028_v27 = vand.u32 4294901760, %v59_v19 }
  0x22   :  { %v4017_v23 = vsub.f32 %v53_v10, %v4003_v15  ;;  %v4020_v24 = vsub.f32 %v56_v11, %v4005_v16  ;;  %3335 = vmatprep.mubr.f32.mxu1 %v4003_v15  ;;  %3316 = vmatpush3.msra.mxu0 %v3993_v4  ;;  %v4026_v26 = vand.u32 4294901760, %v213_v18  ;;  %v4030_v28 = vand.u32 4294901760, %v62_v20 }
  0x23   :  { %v4032_v29 = vand.u32 4294901760, %v220_v21  ;;  %3317 = vmatprep.subr.mxu0 %v3995_v5  ;;  %v201_v30 = vsub.f32 %v199_v14, %v4014_v22  ;;  %v208_v33 = vsub.f32 %v206_v17, %v4022_v25  ;;  %v4042_v35 = vsub.f32 %v59_v19, %v4028_v27 }
  0x24   :  { %v135_v31 = vand.u32 4294901760, %v4017_v23  ;;  %v145_v32 = vand.u32 4294901760, %v4020_v24  ;;  %3318 = vmatpush3.msra.mxu0 %v3995_v5  ;;  %v215_v34 = vsub.f32 %v213_v18, %v4026_v26  ;;  %v4045_v36 = vsub.f32 %v62_v20, %v4030_v28 }
  0x25   :  { %3319 = vmatprep.subr.mxu0 %v3997_v9  ;;  %v202_v37 = vand.u32 4294901760, %v201_v30  ;;  %v209_v40 = vand.u32 4294901760, %v208_v33  ;;  %v155_v41 = vand.u32 4294901760, %v4042_v35  ;;  %v222_v43 = vsub.f32 %v220_v21, %v4032_v29 }
  0x26   :  { %v136_v38 = vsub.f32 %v4017_v23, %v135_v31  ;;  %v146_v39 = vsub.f32 %v4020_v24, %v145_v32  ;;  %3320 = vmatpush3.msra.mxu0 %v3997_v9  ;;  %v165_v42 = vand.u32 4294901760, %v4045_v36  ;;  %v216_v46 = vand.u32 4294901760, %v215_v34 }
  0x27   :  { %3327 = vmatprep.subr.mxu1 %v202_v37  ;;  %3341 = vmatprep.subr.mxu0 %v199_v14  ;;  %v156_v47 = vsub.f32 %v4042_v35, %v155_v41  ;;  %v223_v51 = vand.u32 4294901760, %v222_v43 }
  0x28   :  { %v137_v44 = vand.u32 4294901760, %v136_v38  ;;  %v147_v45 = vand.u32 4294901760, %v146_v39  ;;  %3328 = vmatpush3.msra.mxu1 %v202_v37  ;;  %v166_v48 = vsub.f32 %v4045_v36, %v165_v42 }
  0x29   :  { %3329 = vmatprep.subr.mxu1 %v209_v40  ;;  %v157_v49 = vand.u32 4294901760, %v156_v47 }
  0x2a   :  { %3321 = vmatprep.mubr.f32.mxu0 %v137_v44  ;;  %3330 = vmatpush3.msra.mxu1 %v209_v40  ;;  %v167_v50 = vand.u32 4294901760, %v166_v48 }
  0x2b   :  { %3322 = vmatmul.mubr.f32.vlgmr.msra.gmra.mxu0 %v147_v45  ;;  %3331 = vmatprep.subr.mxu1 %v216_v46 }
  0x2c   :  { %3342 = vmatpush3.msra.mxu0 %v199_v14  ;;  %3324 = vmatprep.mubr.f32.mxu0 %v157_v49 }
  0x2d   :  { %3343 = vmatprep.subr.mxu0 %v206_v17  ;;  %3332 = vmatpush3.msra.mxu1 %v216_v46 }
  0x2e   :  { %3344 = vmatpush3.msra.mxu0 %v206_v17  ;;  %3333 = vmatprep.subr.mxu1 %v223_v51 }
  0x2f   :  { %3325 = vmatmul.mubr.f32.gmra.mxu0 %v167_v50  ;;  %3345 = vmatprep.subr.mxu0 %v213_v18 }
  0x30   :  { %3334 = vmatpush3.msra.mxu1 %v223_v51  ;;  %3346 = vmatpush3.msra.mxu0 %v213_v18 }
  0x31   :  { %3336 = vmatmul.mubr.f32.vlgmr.msra.gmra.mxu1 %v4005_v16  ;;  %3347 = vmatprep.subr.mxu0 %v220_v21 }
  0x32   :  { %3355 = vmatprep.subr.mxu1 %v3991_v3  ;;  %3348 = vmatpush3.msra.mxu0 %v220_v21 }
  0x33   :  { %3349 = vmatprep.mubr.f32.mxu0 %v4017_v23  ;;  %3356 = vmatpush3.msra.mxu1 %v3991_v3 }
  0x34   :  { %3350 = vmatmul.mubr.f32.vlgmr.msra.gmra.mxu0 %v4020_v24  ;;  %3357 = vmatprep.subr.mxu1 %v3993_v4 }
  0x35   :  { %3369 = vmatprep.subr.mxu0 %v4014_v22  ;;  %3338 = vmatprep.mubr.f32.mxu1 %v4028_v27 }
  0x36   :  { %3358 = vmatpush3.msra.mxu1 %v3993_v4  ;;  %3370 = vmatpush3.msra.mxu0 %v4014_v22 }
  0x37   :  { %3339 = vmatmul.mubr.f32.gmra.mxu1 %v4030_v28  ;;  %3359 = vmatprep.subr.mxu1 %v3995_v5 }
  0x38   :  { %3371 = vmatprep.subr.mxu0 %v4022_v25  ;;  %3352 = vmatprep.mubr.f32.mxu0 %v4042_v35 }
  0x39   :  { %3360 = vmatpush3.msra.mxu1 %v3995_v5  ;;  %3372 = vmatpush3.msra.mxu0 %v4022_v25 }
  0x3a   :  { %3361 = vmatprep.subr.mxu1 %v3997_v9  ;;  %3353 = vmatmul.mubr.f32.gmra.mxu0 %v4045_v36 }
  0x3b   :  { %3373 = vmatprep.subr.mxu0 %v4026_v26  ;;  %3362 = vmatpush3.msra.mxu1 %v3997_v9 }
  0x3c   :  { %3363 = vmatprep.mubr.f32.mxu1 %v135_v31  ;;  %3374 = vmatpush3.msra.mxu0 %v4026_v26 }
  0x3d   :  { %3364 = vmatmul.mubr.f32.vlgmr.msra.gmra.mxu1 %v145_v32  ;;  %3375 = vmatprep.subr.mxu0 %v4032_v29 }
  0x3e   :  { %3383 = vmatprep.subr.mxu1 %v3991_v3  ;;  %3376 = vmatpush3.msra.mxu0 %v4032_v29 }
  0x3f   :  { %3377 = vmatprep.mubr.f32.mxu0 %v4003_v15  ;;  %3384 = vmatpush3.msra.mxu1 %v3991_v3 }
  0x40   :  { %3378 = vmatmul.mubr.f32.vlgmr.msra.gmra.mxu0 %v4005_v16  ;;  %3385 = vmatprep.subr.mxu1 %v3993_v4 }
  0x41   :  { %3366 = vmatprep.mubr.f32.mxu1 %v155_v41  ;;  %3386 = vmatpush3.msra.mxu1 %v3993_v4 }
  0x42   :  { %3380 = vmatprep.mubr.f32.mxu0 %v4028_v27  ;;  %3367 = vmatmul.mubr.f32.gmra.mxu1 %v165_v42 }
  0x43   :  { %3387 = vmatprep.subr.mxu1 %v3995_v5  ;;  %3391 = vmatprep.mubr.f32.mxu1 %v4003_v15 }
  0x44   :  { %3388 = vmatpush3.msra.mxu1 %v3995_v5  ;;  %3381 = vmatmul.mubr.f32.gmra.mxu0 %v4030_v28 }
  0x45   :  { %3389 = vmatprep.subr.mxu1 %v3997_v9 }
  0x46   :  { %3390 = vmatpush3.msra.mxu1 %v3997_v9 }
  0x47   :  { %3392 = vmatmul.mubr.f32.vlgmr.msra.gmra.mxu1 %v4005_v16 }
  0x48   :  { %3394 = vmatprep.mubr.f32.mxu1 %v4028_v27 }
  0x4b   :  { %3395 = vmatmul.mubr.f32.gmra.mxu1 %v4030_v28 }
  0xeb   :  { %v3323_v52 = vpop.f32.mrf.mxu0 }
  0xed   :  { %v139_v53 = vpop.f32.mrf.mxu0 }
  0xef   :  { %v3326_v54 = vpop.f32.mrf.mxu0 }
  0xf1   :  { %v159_v55 = vpop.f32.mrf.mxu0  ;;  %v3337_v56 = vpop.f32.mrf.mxu1 }
  0xf2   :  { %v267_v63 = vadd.f32 %v3337_v56, %v3323_v52 }
  0xf3   :  { %v260_v57 = vpop.f32.mrf.mxu1 }
  0xf4   :  { %v3351_v58 = vpop.f32.mrf.mxu0  ;;  %v261_v2 = vadd.f32 %v260_v57, %v139_v53 }
  0xf5   :  { %v366_v4 = vadd.f32 %v3351_v58, %v267_v63 }
  0xf6   :  { %v358_v60 = vpop.f32.mrf.mxu0 }
  0xf7   :  { %v3340_v59 = vpop.f32.mrf.mxu1  ;;  %v359_v7 = vadd.f32 %v358_v60, %v261_v2 }
  0xf8   :  { %v279_v6 = vadd.f32 %v3340_v59, %v3326_v54 }
  0xf9   :  { %v272_v61 = vpop.f32.mrf.mxu1 }
  0xfa   :  { %v3354_v62 = vpop.f32.mrf.mxu0  ;;  %v273_v8 = vadd.f32 %v272_v61, %v159_v55 }
  0xfb   :  { %v380_v15 = vadd.f32 %v3354_v62, %v279_v6 }
  0xfc   :  { %v372_v0 = vpop.f32.mrf.mxu0 }
  0xfd   :  { %v3365_v1 = vpop.f32.mrf.mxu1  ;;  %v373_v16 = vadd.f32 %v372_v0, %v273_v8 }
  0xfe   :  { %v465_v9 = vadd.f32 %v3365_v1, %v366_v4 }
  0xff   :  { %v456_v3 = vpop.f32.mrf.mxu1 }
 0x100   :  { %v3379_v5 = vpop.f32.mrf.mxu0  ;;  %v457_v12 = vadd.f32 %v456_v3, %v359_v7 }
 0x101   :  { %v570_v17 = vadd.f32 %v3379_v5, %v465_v9 }
 0x102   :  { %v563_v10 = vpop.f32.mrf.mxu0  ;;  %v3368_v11 = vpop.f32.mrf.mxu1 }
 0x103   :  { %v481_v19 = vadd.f32 %v3368_v11, %v380_v15  ;;  %v564_v20 = vadd.f32 %v563_v10, %v457_v12  ;;  %v1169_v10 = vld [vmem:[%s4866_s2] sm:$0xff] }
 0x104   :  { %v472_v13 = vpop.f32.mrf.mxu1  ;;  %v3382_v14 = vpop.f32.mrf.mxu0 }
 0x105   :  { %v473_v21 = vadd.f32 %v472_v13, %v373_v16  ;;  %v582_v28 = vadd.f32 %v3382_v14, %v481_v19  ;;  %v1170_v13 = vld [vmem:[%s4866_s2 + $0x8] sm:$0xff]  ;;  %s3964_s2 = smov [#allocation7]  }
 0x106   :  { %v575_v23 = vpop.f32.mrf.mxu0  ;;  %s3015_s26 = sshll.u32 %s3964_s2, 4  ;;  %s3016_s26 = int_to_ptr.vmem [resolvable:$true] %s3015_s26 }
 0x107   :  { %v3393_v18 = vpop.f32.mrf.mxu1  ;;  %v576_v29 = vadd.f32 %v575_v23, %v473_v21  ;;  %s3932_s27 = scalar_lea.vmem %s3016_s26, 128  ;;  %p3937_p11 = scmp.lt.s32.totalorder %s3016_s26, %s3016_s26 }
 0x108   :  { %v663_v22 = vadd.f32 %v3393_v18, %v570_v17  ;;  %p3933_p10 = scmp.ne.s32.totalorder %s3016_s26, %s3932_s27  ;;  %p3938_p12 = scmp.lt.s32.totalorder %s3932_s27, %s3932_s27 }
 0x109   :  { %v656_v24 = vpop.f32.mrf.mxu1 }
 0x10a   :  { %v754_v25 = vand.u32 4294901760, %v663_v22  ;;  %v657_v26 = vadd.f32 %v656_v24, %v564_v20  ;;  %p3939_p13 = por %p3938_p12, %p3937_p11 }
 0x10b   :  { %v3396_v27 = vpop.f32.mrf.mxu1 }
 0x10c   :  { %v755_v30 = vsub.f32 %v663_v22, %v754_v25  ;;  %v744_v31 = vand.u32 4294901760, %v657_v26  ;;  %v675_v35 = vadd.f32 %v3396_v27, %v582_v28  ;;  %p3940_p0 = pnand %p3939_p13, %p3933_p10 }
 0x10d   :  { %v668_v32 = vpop.f32.mrf.mxu1 }
 0x10e   :  { %v756_v33 = vand.u32 4294901760, %v755_v30  ;;  %v745_v34 = vsub.f32 %v657_v26, %v744_v31  ;;  %v669_v36 = vadd.f32 %v668_v32, %v576_v29  ;;  %3404 = vmatprep.mubr.f32.mxu1 %v744_v31  ;;  %v4103_v40 = vand.u32 4294901760, %v675_v35 }
 0x110   :  { %v709_v37 = vand.u32 4294901760, %v669_v36  ;;  %v746_v38 = vand.u32 4294901760, %v745_v34  ;;  %v757_v39 = vsub.f32 %v755_v30, %v756_v33  ;;  %v4106_v46 = vsub.f32 %v675_v35, %v4103_v40 }
 0x112   :  { %v796_v41 = vsub.f32 %v669_v36, %v709_v37  ;;  %3397 = vmatprep.subr.mxu0 %v709_v37  ;;  %v747_v42 = vsub.f32 %v745_v34, %v746_v38  ;;  %v758_v45 = vand.u32 4294901760, %v757_v39  ;;  %v4109_v49 = vand.u32 4294901760, %v4106_v46  ;;  %v1705_v36 = vld [vmem:[#allocation5 + $0x88] sm:$0xff] }
 0x113   :  { %3398 = vmatpush3.xpose.msra.mxu0 %v709_v37 }
 0x114   :  { %3407 = vmatprep.subr.mxu0 %v796_v41  ;;  %v748_v43 = vand.u32 4294901760, %v747_v42  ;;  %v797_v44 = vand.u32 4294901760, %v796_v41  ;;  %v1322_v50 = vsub.f32 %v4106_v46, %v4109_v49  ;;  %v1704_v42 = vld [vmem:[#allocation5 + $0x80] sm:$0xff] }
 0x116   :  { %3399 = vmatprep.mubr.f32.mxu0 %v748_v43  ;;  %v798_v47 = vsub.f32 %v796_v41, %v797_v44  ;;  %v1323_v51 = vand.u32 4294901760, %v1322_v50  ;;  %v4141_v50 = vand.u32 4294901760, %v1704_v42 }
 0x117   :  { %3400 = vmatmul.mubr.f32.vlgmr.msra.gmra.mxu0 %v758_v45 }
 0x118   :  { %3408 = vmatpush3.xpose.msra.mxu0 %v796_v41  ;;  %3409 = vmatprep.mubr.f32.mxu0 %v745_v34  ;;  %v799_v48 = vand.u32 4294901760, %v798_v47 }
 0x119   :  { %3417 = vmatprep.subr.mxu0 %v797_v44 }
 0x11a   :  { %3402 = vmatprep.subr.mxu1 %v799_v48 }
 0x11b   :  { %3403 = vmatpush3.xpose.msra.mxu1 %v799_v48  ;;  %3410 = vmatmul.mubr.f32.vlgmr.msra.gmra.mxu0 %v755_v30  ;;  %v1707_v30 = vld [vmem:[#allocation5 + $0x98] sm:$0xff] }
 0x11c   :  { %3418 = vmatpush3.xpose.msra.mxu0 %v797_v44  ;;  %3412 = vmatprep.subr.mxu1 %v709_v37  ;;  %v4135_v44 = vand.u32 4294901760, %v1705_v36 }
 0x11d   :  { %3419 = vmatprep.mubr.f32.mxu0 %v744_v31  ;;  %3427 = vmatprep.subr.mxu0 %v4103_v40 }
 0x11e   :  { %3405 = vmatmul.mubr.f32.vlgmr.msra.gmra.mxu1 %v754_v25 }
 0x11f   :  { %3413 = vmatpush3.xpose.msra.mxu1 %v709_v37  ;;  %3414 = vmatprep.mubr.f32.mxu1 %v746_v38 }
 0x120   :  { %3420 = vmatmul.mubr.f32.vlgmr.msra.gmra.mxu0 %v754_v25  ;;  %3422 = vmatprep.subr.mxu1 %v709_v37 }
 0x121   :  { %3428 = vmatpush3.msra.mxu0 %v4103_v40 }
 0x122   :  { %3437 = vmatprep.subr.mxu0 %v4106_v46  ;;  %3415 = vmatmul.mubr.f32.vlgmr.msra.gmra.mxu1 %v756_v33  ;;  %v4127_v33 = vand.u32 4294901760, %v1707_v30 }
 0x123   :  { %3423 = vmatpush3.xpose.msra.mxu1 %v709_v37  ;;  %3424 = vmatprep.mubr.f32.mxu1 %v744_v31  ;;  %v1706_v31 = vld [vmem:[#allocation5 + $0x90] sm:$0xff] }
 0x124   :  { %3432 = vmatprep.subr.mxu1 %v1323_v51  ;;  %v4129_v35 = vand.u32 4294901760, %v1706_v31  ;;  %v4133_v41 = vsub.f32 %v1707_v30, %v4127_v33 }
 0x126   :  { %3425 = vmatmul.mubr.f32.vlgmr.msra.gmra.mxu1 %v754_v25  ;;  %v4138_v47 = vsub.f32 %v1706_v31, %v4129_v35 }
 0x127   :  { %3433 = vmatpush3.msra.mxu1 %v1323_v51 }
 0x128   :  { %3442 = vmatprep.subr.mxu1 %v4103_v40 }
 0x1d7   :  { %v3401_v52 = vpop.f32.mrf.mxu0 }
 0x1d9   :  { %v750_v53 = vpop.f32.mrf.mxu0 }
 0x1db   :  { %v3411_v54 = vpop.f32.mrf.mxu0 }
 0x1dd   :  { %v916_v55 = vpop.f32.mrf.mxu0 }
 0x1de   :  { %v3406_v56 = vpop.f32.mrf.mxu1 }
 0x1df   :  { %v843_v57 = vadd.f32 %v3406_v56, %v3401_v52 }
 0x1e0   :  { %v836_v58 = vpop.f32.mrf.mxu1  ;;  %v3421_v61 = vpop.f32.mrf.mxu0 }
 0x1e1   :  { %v837_v59 = vadd.f32 %v836_v58, %v750_v53  ;;  %v924_v60 = vadd.f32 %v3411_v54, %v843_v57  ;;  %v1802_v53 = vand.u32 4294901760, %v4133_v41  ;;  %v4145_v54 = vsub.f32 %v1705_v36, %v4135_v44 }
 0x1e2   :  { %v3416_v62 = vpop.f32.mrf.mxu1  ;;  %v1079_v4 = vpop.f32.mrf.mxu0  ;;  %v1809_v57 = vand.u32 4294901760, %v4138_v47  ;;  %v4150_v58 = vsub.f32 %v1704_v42, %v4141_v50 }
 0x1e3   :  { %v1006_v63 = vadd.f32 %v3416_v62, %v924_v60  ;;  %v917_v0 = vadd.f32 %v916_v55, %v837_v59  ;;  %v1816_v62 = vand.u32 4294901760, %v4145_v54 }
 0x1e4   :  { %v997_v1 = vpop.f32.mrf.mxu1 }
 0x1e5   :  { %v998_v2 = vadd.f32 %v997_v1, %v917_v0  ;;  %v1086_v3 = vadd.f32 %v3421_v61, %v1006_v63  ;;  %v1803_v61 = vsub.f32 %v4133_v41, %v1802_v53  ;;  %v1810_v0 = vsub.f32 %v4138_v47, %v1809_v57 }
 0x1e6   :  { %v3426_v5 = vpop.f32.mrf.mxu1  ;;  %v1823_v1 = vand.u32 4294901760, %v4150_v58 }
 0x1e7   :  { %v1164_v6 = vadd.f32 %v3426_v5, %v1086_v3  ;;  %v1080_v7 = vadd.f32 %v1079_v4, %v998_v2  ;;  %v3962_v3 = vmov 0.0   ;;  %v1804_v4 = vand.u32 4294901760, %v1803_v61 }
 0x1e8   :  { %v1157_v8 = vpop.f32.mrf.mxu1  ;;  %v1817_v5 = vsub.f32 %v4145_v54, %v1816_v62 }
 0x1e9   :  { %v1158_v9 = vadd.f32 %v1157_v8, %v1080_v7  ;;  %v1168_v11 = vmul.f32 0.5, %v1164_v6  ;;  %v1811_v6 = vand.u32 4294901760, %v1810_v0 }
 0x1ea   :  { %v1818_v7 = vand.u32 4294901760, %v1817_v5 }
 0x1eb   :  { %v1167_v12 = vmul.f32 0.5, %v1158_v9  ;;  %v1172_v16 = vadd.f32 %v1170_v13, %v1168_v11  ;;  %v1702_v9 = vld [vmem:[#allocation5 + $0x70] sm:$0xff] }
 0x1ec   :  { %v4190_v11 = vand.u32 4294901760, %v1702_v9 }
 0x1ed   :  { %v1171_v14 = vadd.f32 %v1169_v10, %v1167_v12  ;;  %v1177_v17 = vsel %vm1173_vm1, %v1172_v16, -inf  ;;  %v1701_v12 = vld [vmem:[#allocation5 + $0x68] sm:$0xff] }
 0x1ef   :  { %v1174_v15 = vsel %vm1173_vm1, %v1171_v14, -inf }
 0x1f0   :  { %1175 = vmax.xlane.f32.xlu0 %v1174_v15  ;;  %v4198_v15 = vand.u32 4294901760, %v1701_v12 }
 0x1f4   :  { %1178 = vmax.xlane.f32.xlu0 %v1177_v17 }
 0x279   :  { %v1176_v18 = vpop.xlane.xlu0 %1175 }
 0x27a   :  { %v1180_v19 = vsub.f32 %v1171_v14, %v1176_v18  ;;  %v4196_v14 = vsub.f32 %v1702_v9, %v4190_v11 }
 0x27c   :  { %v1182_v20 = vmul.f32 1.442695, %v1180_v19  ;;  %v1837_v18 = vand.u32 4294901760, %v4196_v14  ;;  %v4207_v19 = vsub.f32 %v1701_v12, %v4198_v15 }
 0x27d   :  { %v1179_v21 = vpop.xlane.xlu0 %1178 }
 0x27e   :  { %3884 = vpow2.f32 %v1182_v20  ;;  %v1181_v22 = vsub.f32 %v1172_v16, %v1179_v21  ;;  %v1700_v16 = vld [vmem:[#allocation5 + $0x60] sm:$0xff]  ;;  %v1699_v21 = vld [vmem:[#allocation5 + $0x58] sm:$0xff] }
 0x27f   :  { %v4209_v20 = vand.u32 4294901760, %v1700_v16 }
 0x280   :  { %v1184_v23 = vmul.f32 1.442695, %v1181_v22 }
 0x282   :  { %3886 = vpow2.f32 %v1184_v23  ;;  %v1838_v23 = vsub.f32 %v4196_v14, %v1837_v18 }
 0x28b   :  { %v3885_v24 = vpop.eup %3884 }
 0x28c   :  { %v1186_v25 = vsel %vm1173_vm1, %v3885_v24, 0.0 }
 0x28d   :  { %1187 = vadd.xlane.f32.xlu1 %v1186_v25  ;;  %v4218_v25 = vsub.f32 %v1700_v16, %v4209_v20 }
 0x28f   :  { %v3887_v26 = vpop.eup %3886  ;;  %v1851_v30 = vand.u32 4294901760, %v4218_v25 }
 0x290   :  { %v1189_v27 = vsel %vm1173_vm1, %v3887_v26, 0.0 }
 0x291   :  { %1190 = vadd.xlane.f32.xlu1 %v1189_v27  ;;  %v1698_v27 = vld [vmem:[#allocation5 + $0x50] sm:$0xff] }
 0x292   :  { %v4228_v31 = vand.u32 4294901760, %v1698_v27 }
 0x316   :  { %v1188_v28 = vpop.xlane.xlu1 %1187 }
 0x317   :  { %3888 = vrcp.f32 %v1188_v28  ;;  %v1839_v28 = vand.u32 4294901760, %v1838_v23 }
 0x31a   :  { %v1191_v29 = vpop.xlane.xlu1 %1190 }
 0x31b   :  { %3890 = vrcp.f32 %v1191_v29 }
 0x324   :  { %v3889_v32 = vpop.eup %3888 }
 0x325   :  { %v1193_v34 = vmul.f32 %v3889_v32, %v3885_v24  ;;  %v1844_v24 = vand.u32 4294901760, %v4207_v19 }
 0x327   :  { %v1197_v37 = vsel %vm1173_vm1, %v1193_v34, 0  ;;  %v1845_v29 = vsub.f32 %v4207_v19, %v1844_v24  ;;  %v1697_v34 = vld [vmem:[#allocation5 + $0x48] sm:$0xff] }
 0x328   :  { %v3891_v38 = vpop.eup %3890  ;;  %v1268_v39 = vand.u32 4294901760, %v1197_v37 }
 0x329   :  { %v1195_v43 = vmul.f32 %v3891_v38, %v3887_v26  ;;  %v4221_v26 = vand.u32 4294901760, %v1699_v21  ;;  %v1846_v36 = vand.u32 4294901760, %v1845_v29  ;;  %v4239_v38 = vsub.f32 %v1698_v27, %v4228_v31 }
 0x32a   :  { %3434 = vmatprep.mubr.f32.mxu1 %v1268_v39  ;;  %v1269_v45 = vsub.f32 %v1197_v37, %v1268_v39  ;;  %v1852_v37 = vsub.f32 %v4218_v25, %v1851_v30 }
 0x32b   :  { %v1200_v48 = vsel %vm1173_vm1, %v1195_v43, 0  ;;  %v4232_v32 = vsub.f32 %v1699_v21, %v4221_v26  ;;  %v1696_v43 = vld [vmem:[#allocation5 + $0x40] sm:$0xff] }
 0x32c   :  { %v1278_v51 = vand.u32 4294901760, %v1200_v48  ;;  %v1270_v52 = vand.u32 4294901760, %v1269_v45  ;;  %v1692_v21 = vld [vmem:[#allocation5 + $0x20] sm:$0xff] }
 0x32d   :  { %v4875_v42 = vand.u32 4294901760, %v4232_v32 }
 0x32e   :  { %v1279_v55 = vsub.f32 %v1200_v48, %v1278_v51  ;;  %3435 = vmatmul.mubr.f32.vlgmr.msra.gmra.mxu1 %v1278_v51  ;;  %v1271_v56 = vsub.f32 %v1269_v45, %v1270_v52  ;;  %v4874_v48 = vand.u32 4294901760, %v4239_v38 }
 0x32f   :  { %3443 = vmatpush3.msra.mxu1 %v4103_v40  ;;  %3444 = vmatprep.mubr.f32.mxu1 %v1270_v52  ;;  %v4251_v52 = vand.u32 4294901760, %v1696_v43 }
 0x330   :  { %3452 = vmatprep.subr.mxu1 %v4103_v40  ;;  %v1272_v59 = vand.u32 4294901760, %v1271_v56  ;;  %v1280_v60 = vand.u32 4294901760, %v1279_v55  ;;  %v1695_v56 = vld [vmem:[#allocation5 + $0x38] sm:$0xff] }
 0x331   :  { %v4264_v61 = vsub.f32 %v1696_v43, %v4251_v52 }
 0x332   :  { %3429 = vmatprep.mubr.f32.mxu0 %v1272_v59  ;;  %3445 = vmatmul.mubr.f32.vlgmr.msra.gmra.mxu1 %v1280_v60  ;;  %v1281_v63 = vsub.f32 %v1279_v55, %v1280_v60  ;;  %v1866_v59 = vsub.f32 %v4239_v38, %v4874_v48 }
 0x333   :  { %3453 = vmatpush3.msra.mxu1 %v4103_v40  ;;  %3454 = vmatprep.mubr.f32.mxu1 %v1268_v39  ;;  %v1824_v40 = vsub.f32 %v4150_v58, %v1823_v1 }
 0x334   :  { %v1282_v2 = vand.u32 4294901760, %v1281_v63  ;;  %3492 = vmatprep.subr.mxu1 %v3962_v3  ;;  %v4266_v63 = vand.u32 4294901760, %v1695_v56 }
 0x335   :  { %v1825_v8 = vand.u32 4294901760, %v1824_v40 }
 0x336   :  { %3430 = vmatmul.mubr.f32.vlgmr.msra.gmra.mxu0 %v1282_v2  ;;  %3455 = vmatmul.mubr.f32.vlgmr.msra.gmra.mxu1 %v1278_v51  ;;  %v1694_v2 = vld [vmem:[#allocation5 + $0x30] sm:$0xff]  ;;  %v4276_v40 = vsub.f32 %v1695_v56, %v4266_v63 }
 0x337   :  { %3438 = vmatpush3.msra.mxu0 %v4106_v46  ;;  %3439 = vmatprep.mubr.f32.mxu0 %v1269_v45  ;;  %v1703_v46 = vld [vmem:[#allocation5 + $0x78] sm:$0xff]  ;;  %v1853_v45 = vand.u32 4294901760, %v1852_v37 }
 0x338   :  { %3447 = vmatprep.subr.mxu0 %v4109_v49  ;;  %3493 = vmatpush3.msra.mxu1 %v1804_v4  ;;  %v1867_v4 = vand.u32 4294901760, %v1866_v59  ;;  %v4871_v12 = vand.u32 4294901760, %v4276_v40 }
 0x339   :  { %3494 = vmatprep.subr.mxu1 %v3962_v3  ;;  %3524 = vmatprep.mubr.msk.f32.mxu1 %vm3963_vm2, %v3962_v3 }
 0x33a   :  { %3440 = vmatmul.mubr.f32.vlgmr.msra.gmra.mxu0 %v1279_v55  ;;  %3495 = vmatpush3.msra.mxu1 %v1811_v6  ;;  %v1859_v55 = vsub.f32 %v4232_v32, %v4875_v42  ;;  %v4872_v6 = vand.u32 4294901760, %v4264_v61  ;;  %v1887_v23 = vsub.f32 %v4276_v40, %v4871_v12 }
 0x33b   :  { %3448 = vmatpush3.msra.mxu0 %v4109_v49  ;;  %3449 = vmatprep.mubr.f32.mxu0 %v1268_v39  ;;  %v4185_v49 = vand.u32 4294901760, %v1703_v46  ;;  %v4241_v39 = vand.u32 4294901760, %v1697_v34 }
 0x33c   :  { %3496 = vmatprep.subr.mxu1 %v3962_v3  ;;  %3457 = vmatprep.subr.mxu0 %v3962_v3  ;;  %v1860_v0 = vand.u32 4294901760, %v1859_v55  ;;  %v1880_v9 = vsub.f32 %v4264_v61, %v4872_v6 }
 0x33d   :  { %3497 = vmatpush3.msra.mxu1 %v1818_v7  ;;  %v4188_v10 = vsub.f32 %v1703_v46, %v4185_v49  ;;  %v4279_v7 = vand.u32 4294901760, %v1694_v2 }
 0x33e   :  { %3450 = vmatmul.mubr.f32.vlgmr.msra.gmra.mxu0 %v1278_v51  ;;  %3498 = vmatprep.subr.mxu1 %v3962_v3  ;;  %v4249_v51 = vsub.f32 %v1697_v34, %v4241_v39  ;;  %v1888_v34 = vand.u32 4294901760, %v1887_v23 }
 0x33f   :  { %3499 = vmatpush3.msra.mxu1 %v1825_v8  ;;  %3458 = vmatpush3.msra.mxu0 %v4127_v33  ;;  %v1830_v13 = vand.u32 4294901760, %v4188_v10  ;;  %v1693_v8 = vld [vmem:[#allocation5 + $0x28] sm:$0xff] }
 0x340   :  { %3500 = vmatprep.subr.mxu1 %v3962_v3  ;;  %3459 = vmatprep.subr.mxu0 %v3962_v3  ;;  %v4873_v60 = vand.u32 4294901760, %v4249_v51  ;;  %v4287_v16 = vand.u32 4294901760, %v1693_v8 }
 0x341   :  { %3460 = vmatpush3.msra.mxu0 %v4129_v35  ;;  %v1831_v17 = vsub.f32 %v4188_v10, %v1830_v13  ;;  %3489 = vmatprep.mubr.msk.f32.mxu0 %vm3963_vm2, %v3962_v3 }
 0x342   :  { %3461 = vmatprep.subr.mxu0 %v3962_v3  ;;  %v1873_v5 = vsub.f32 %v4249_v51, %v4873_v60  ;;  %v4299_v27 = vsub.f32 %v1693_v8, %v4287_v16 }
 0x343   :  { %3462 = vmatpush3.msra.mxu0 %v4135_v44  ;;  %v1832_v22 = vand.u32 4294901760, %v1831_v17  ;;  %v4291_v17 = vsub.f32 %v1694_v2, %v4279_v7 }
 0x344   :  { %3463 = vmatprep.subr.mxu0 %v3962_v3  ;;  %v1874_v46 = vand.u32 4294901760, %v1873_v5 }
 0x345   :  { %3464 = vmatpush3.msra.mxu0 %v4141_v50  ;;  %3501 = vmatpush3.msra.mxu1 %v1832_v22  ;;  %v1881_v22 = vand.u32 4294901760, %v1880_v9  ;;  %v4870_v29 = vand.u32 4294901760, %v4291_v17 }
 0x346   :  { %3465 = vmatprep.subr.mxu0 %v3962_v3  ;;  %3502 = vmatprep.subr.mxu1 %v3962_v3 }
 0x347   :  { %3466 = vmatpush3.msra.mxu0 %v4185_v49  ;;  %3503 = vmatpush3.msra.mxu1 %v1839_v28  ;;  %v4301_v28 = vand.u32 4294901760, %v1692_v21  ;;  %v1894_v43 = vsub.f32 %v4291_v17, %v4870_v29 }
 0x348   :  { %3467 = vmatprep.subr.mxu0 %v3962_v3  ;;  %3504 = vmatprep.subr.mxu1 %v3962_v3 }
 0x349   :  { %3468 = vmatpush3.msra.mxu0 %v4190_v11  ;;  %3505 = vmatpush3.msra.mxu1 %v1846_v36  ;;  %v4869_v36 = vand.u32 4294901760, %v4299_v27  ;;  %v4309_v37 = vsub.f32 %v1692_v21, %v4301_v28  ;;  %v1895_v56 = vand.u32 4294901760, %v1894_v43 }
 0x34a   :  { %3469 = vmatprep.subr.mxu0 %v3962_v3  ;;  %3506 = vmatprep.subr.mxu1 %v3962_v3 }
 0x34b   :  { %3470 = vmatpush3.msra.mxu0 %v4198_v15  ;;  %3507 = vmatpush3.msra.mxu1 %v1853_v45  ;;  %v1901_v45 = vsub.f32 %v4299_v27, %v4869_v36  ;;  %v4868_v55 = vand.u32 4294901760, %v4309_v37 }
 0x34c   :  { %3471 = vmatprep.subr.mxu0 %v3962_v3  ;;  %3508 = vmatprep.subr.mxu1 %v3962_v3 }
 0x34d   :  { %3472 = vmatpush3.msra.mxu0 %v4209_v20  ;;  %3509 = vmatpush3.msra.mxu1 %v1860_v0  ;;  %v1902_v59 = vand.u32 4294901760, %v1901_v45  ;;  %v1908_v0 = vsub.f32 %v4309_v37, %v4868_v55 }
 0x34e   :  { %3473 = vmatprep.subr.mxu0 %v3962_v3  ;;  %3510 = vmatprep.subr.mxu1 %v3962_v3 }
 0x34f   :  { %3474 = vmatpush3.msra.mxu0 %v4221_v26  ;;  %3511 = vmatpush3.msra.mxu1 %v1867_v4  ;;  %v1909_v2 = vand.u32 4294901760, %v1908_v0 }
 0x350   :  { %3475 = vmatprep.subr.mxu0 %v3962_v3  ;;  %3512 = vmatprep.subr.mxu1 %v3962_v3 }
 0x351   :  { %3476 = vmatpush3.msra.mxu0 %v4228_v31  ;;  %3513 = vmatpush3.msra.mxu1 %v1874_v46 }
 0x352   :  { %3477 = vmatprep.subr.mxu0 %v3962_v3  ;;  %3514 = vmatprep.subr.mxu1 %v3962_v3 }
 0x353   :  { %3478 = vmatpush3.msra.mxu0 %v4241_v39  ;;  %3515 = vmatpush3.msra.mxu1 %v1881_v22 }
 0x354   :  { %3479 = vmatprep.subr.mxu0 %v3962_v3  ;;  %3516 = vmatprep.subr.mxu1 %v3962_v3 }
 0x355   :  { %3480 = vmatpush3.msra.mxu0 %v4251_v52  ;;  %3517 = vmatpush3.msra.mxu1 %v1888_v34 }
 0x356   :  { %3481 = vmatprep.subr.mxu0 %v3962_v3  ;;  %3518 = vmatprep.subr.mxu1 %v3962_v3 }
 0x357   :  { %3482 = vmatpush3.msra.mxu0 %v4266_v63  ;;  %3519 = vmatpush3.msra.mxu1 %v1895_v56 }
 0x358   :  { %3483 = vmatprep.subr.mxu0 %v3962_v3  ;;  %3520 = vmatprep.subr.mxu1 %v3962_v3 }
 0x359   :  { %3484 = vmatpush3.msra.mxu0 %v4279_v7  ;;  %3521 = vmatpush3.msra.mxu1 %v1902_v59 }
 0x35a   :  { %3485 = vmatprep.subr.mxu0 %v3962_v3  ;;  %3522 = vmatprep.subr.mxu1 %v3962_v3 }
 0x35b   :  { %3486 = vmatpush3.msra.mxu0 %v4287_v16  ;;  %3523 = vmatpush3.msra.mxu1 %v1909_v2 }
 0x35c   :  { %3487 = vmatprep.subr.mxu0 %v3962_v3  ;;  %3562 = vmatprep.subr.mxu1 %v3962_v3 }
 0x35d   :  { %3488 = vmatpush3.msra.mxu0 %v4301_v28 }
 0x35e   :  { %3527 = vmatprep.subr.mxu0 %v3962_v3 }
 0x3ee   :  { %v3436_v4 = vpop.f32.mrf.mxu1 }
 0x3f0   :  { %v1360_v5 = vpop.f32.mrf.mxu1 }
 0x3f2   :  { %v3446_v8 = vpop.f32.mrf.mxu1 }
 0x3f4   :  { %v1521_v22 = vpop.f32.mrf.mxu1 }
 0x3f6   :  { %v3431_v46 = vpop.f32.mrf.mxu0  ;;  %v3456_v0 = vpop.f32.mrf.mxu1 }
 0x3f7   :  { %v1367_v9 = vadd.f32 %v3436_v4, %v3431_v46 }
 0x3f8   :  { %v1274_v21 = vpop.f32.mrf.mxu0  ;;  %v1681_v60 = vpop.f32.mrf.mxu1 }
 0x3f9   :  { %v1361_v34 = vadd.f32 %v1360_v5, %v1274_v21  ;;  %v4880_v21 = vand.u32 4294901760, %v4276_v40 }
 0x3fa   :  { %v3441_v23 = vpop.f32.mrf.mxu0 }
 0x3fb   :  { %v1448_v43 = vadd.f32 %v3441_v23, %v1367_v9 }
 0x3fc   :  { %v1440_v45 = vpop.f32.mrf.mxu0 }
 0x3fd   :  { %v1441_v56 = vadd.f32 %v1440_v45, %v1361_v34  ;;  %v1530_v59 = vadd.f32 %v3446_v8, %v1448_v43  ;;  %v2354_v45 = vld [vmem:[#allocation5 + $0xc0] sm:$0xff] }
 0x3fe   :  { %v3451_v2 = vpop.f32.mrf.mxu0 }
 0x3ff   :  { %v1610_v55 = vadd.f32 %v3451_v2, %v1530_v59  ;;  %v1522_v36 = vadd.f32 %v1521_v22, %v1441_v56  ;;  %v4881_v56 = vand.u32 4294901760, %v4291_v17 }
 0x400   :  { %v1603_v29 = vpop.f32.mrf.mxu0 }
 0x401   :  { %v4333_v12 = vadd.f32 %v3456_v0, %v1610_v55  ;;  %v1604_v6 = vadd.f32 %v1603_v29, %v1522_v36  ;;  %v2356_v55 = vld [vmem:[#allocation5 + $0xd0] sm:$0xff] }
 0x402   :  { %v4545_v23 = vand.u32 4294901760, %v2356_v55 }
 0x403   :  { %v1682_v48 = vadd.f32 %v1681_v60, %v1604_v6 }
 0x405   :  { %v4335_v42 = vand.u32 4294901760, %v1682_v48 }
 0x407   :  { %v4338_v4 = vsub.f32 %v1682_v48, %v4335_v42  ;;  %3525 = vmatmul.mubr.f32.vlgmr.msra.gmra.mxu1 %v4335_v42 }
 0x408   :  { %3563 = vmatpush3.msra.mxu1 %v4127_v33  ;;  %3594 = vmatprep.mubr.msk.f32.mxu1 %vm3963_vm2, %v3962_v3 }
 0x409   :  { %v1791_v5 = vand.u32 4294901760, %v4338_v4  ;;  %3564 = vmatprep.subr.mxu1 %v3962_v3 }
 0x40a   :  { %3565 = vmatpush3.msra.mxu1 %v4129_v35 }
 0x40b   :  { %3566 = vmatprep.subr.mxu1 %v3962_v3  ;;  %v1792_v60 = vsub.f32 %v4338_v4, %v1791_v5 }
 0x40c   :  { %3567 = vmatpush3.msra.mxu1 %v4135_v44 }
 0x40d   :  { %3568 = vmatprep.subr.mxu1 %v3962_v3  ;;  %v1793_v48 = vand.u32 4294901760, %v1792_v60 }
 0x40e   :  { %3569 = vmatpush3.msra.mxu1 %v4141_v50 }
 0x40f   :  { %3570 = vmatprep.subr.mxu1 %v3962_v3  ;;  %3490 = vmatmul.mubr.f32.vlgmr.msra.gmra.mxu0 %v1793_v48  ;;  %v4569_v48 = vsub.f32 %v2356_v55, %v4545_v23 }
 0x410   :  { %3528 = vmatpush3.msra.mxu0 %v4133_v41  ;;  %3571 = vmatpush3.msra.mxu1 %v4185_v49 }
 0x411   :  { %3529 = vmatprep.subr.mxu0 %v3962_v3  ;;  %3572 = vmatprep.subr.mxu1 %v3962_v3 }
 0x412   :  { %3530 = vmatpush3.msra.mxu0 %v4138_v47  ;;  %3573 = vmatpush3.msra.mxu1 %v4190_v11 }
 0x413   :  { %3531 = vmatprep.subr.mxu0 %v3962_v3  ;;  %3574 = vmatprep.subr.mxu1 %v3962_v3 }
 0x414   :  { %3532 = vmatpush3.msra.mxu0 %v4145_v54  ;;  %3575 = vmatpush3.msra.mxu1 %v4198_v15 }
 0x415   :  { %3533 = vmatprep.subr.mxu0 %v3962_v3  ;;  %3576 = vmatprep.subr.mxu1 %v3962_v3 }
 0x416   :  { %3534 = vmatpush3.msra.mxu0 %v4150_v58  ;;  %3577 = vmatpush3.msra.mxu1 %v4209_v20 }
 0x417   :  { %3535 = vmatprep.subr.mxu0 %v3962_v3  ;;  %3578 = vmatprep.subr.mxu1 %v3962_v3 }
 0x418   :  { %3536 = vmatpush3.msra.mxu0 %v4188_v10  ;;  %3579 = vmatpush3.msra.mxu1 %v4221_v26  ;;  %v2360_v10 = vld [vmem:[#allocation5 + $0xf0] sm:$0xff] }
 0x419   :  { %3537 = vmatprep.subr.mxu0 %v3962_v3  ;;  %3580 = vmatprep.subr.mxu1 %v3962_v3 }
 0x41a   :  { %3538 = vmatpush3.msra.mxu0 %v4196_v14  ;;  %3581 = vmatpush3.msra.mxu1 %v4228_v31  ;;  %v4876_v14 = vand.u32 4294901760, %v4232_v32 }
 0x41b   :  { %3539 = vmatprep.subr.mxu0 %v3962_v3  ;;  %3582 = vmatprep.subr.mxu1 %v3962_v3 }
 0x41c   :  { %3540 = vmatpush3.msra.mxu0 %v4207_v19  ;;  %3583 = vmatpush3.msra.mxu1 %v4241_v39  ;;  %v4488_v19 = vand.u32 4294901760, %v2360_v10 }
 0x41d   :  { %3541 = vmatprep.subr.mxu0 %v3962_v3  ;;  %3584 = vmatprep.subr.mxu1 %v3962_v3 }
 0x41e   :  { %3542 = vmatpush3.msra.mxu0 %v4218_v25  ;;  %3585 = vmatpush3.msra.mxu1 %v4251_v52  ;;  %v4516_v6 = vsub.f32 %v2360_v10, %v4488_v19 }
 0x41f   :  { %3543 = vmatprep.subr.mxu0 %v3962_v3  ;;  %3586 = vmatprep.subr.mxu1 %v3962_v3 }
 0x420   :  { %3544 = vmatpush3.msra.mxu0 %v4232_v32  ;;  %3587 = vmatpush3.msra.mxu1 %v4266_v63  ;;  %v4878_v32 = vand.u32 4294901760, %v4249_v51  ;;  %v2495_v22 = vand.u32 4294901760, %v4516_v6 }
 0x421   :  { %3545 = vmatprep.subr.mxu0 %v3962_v3  ;;  %3588 = vmatprep.subr.mxu1 %v3962_v3 }
 0x422   :  { %3546 = vmatpush3.msra.mxu0 %v4239_v38  ;;  %3589 = vmatpush3.msra.mxu1 %v4279_v7  ;;  %v2496_v60 = vsub.f32 %v4516_v6, %v2495_v22 }
 0x423   :  { %3547 = vmatprep.subr.mxu0 %v3962_v3  ;;  %3590 = vmatprep.subr.mxu1 %v3962_v3 }
 0x424   :  { %3548 = vmatpush3.msra.mxu0 %v4249_v51  ;;  %3591 = vmatpush3.msra.mxu1 %v4287_v16  ;;  %v4879_v51 = vand.u32 4294901760, %v4264_v61 }
 0x425   :  { %3549 = vmatprep.subr.mxu0 %v3962_v3  ;;  %3592 = vmatprep.subr.mxu1 %v3962_v3 }
 0x426   :  { %3550 = vmatpush3.msra.mxu0 %v4264_v61  ;;  %3593 = vmatpush3.msra.mxu1 %v4301_v28 }
 0x427   :  { %3551 = vmatprep.subr.mxu0 %v3962_v3  ;;  %3595 = vmatmul.mubr.f32.vlgmr.msra.gmra.mxu1 %v1791_v5  ;;  %v2353_v5 = vld [vmem:[#allocation5 + $0xb8] sm:$0xff] }
 0x428   :  { %3632 = vmatprep.subr.mxu1 %v3962_v3  ;;  %3552 = vmatpush3.msra.mxu0 %v4276_v40 }
 0x429   :  { %3633 = vmatpush3.msra.mxu1 %v4127_v33  ;;  %3553 = vmatprep.subr.mxu0 %v3962_v3  ;;  %v2365_v33 = vld [vmem:[#allocation5 + $0x118] sm:$0xff] }
 0x42a   :  { %3634 = vmatprep.subr.mxu1 %v3962_v3  ;;  %3554 = vmatpush3.msra.mxu0 %v4291_v17  ;;  %v4437_v41 = vand.u32 4294901760, %v2365_v33  ;;  %v4882_v17 = vand.u32 4294901760, %v4299_v27 }
 0x42b   :  { %3635 = vmatpush3.msra.mxu1 %v4129_v35  ;;  %3555 = vmatprep.subr.mxu0 %v3962_v3  ;;  %v2364_v35 = vld [vmem:[#allocation5 + $0x110] sm:$0xff] }
 0x42c   :  { %3636 = vmatprep.subr.mxu1 %v3962_v3  ;;  %3556 = vmatpush3.msra.mxu0 %v4299_v27  ;;  %v4444_v47 = vand.u32 4294901760, %v2364_v35  ;;  %v4883_v27 = vand.u32 4294901760, %v4309_v37 }
 0x42d   :  { %3637 = vmatpush3.msra.mxu1 %v4135_v44  ;;  %3557 = vmatprep.subr.mxu0 %v3962_v3  ;;  %v2363_v44 = vld [vmem:[#allocation5 + $0x108] sm:$0xff] }
 0x42e   :  { %3638 = vmatprep.subr.mxu1 %v3962_v3  ;;  %3558 = vmatpush3.msra.mxu0 %v4309_v37  ;;  %v4454_v54 = vand.u32 4294901760, %v2363_v44  ;;  %v2497_v37 = vand.u32 4294901760, %v2496_v60 }
 0x42f   :  { %3559 = vmatprep.mubr.msk.f32.mxu0 %vm3963_vm2, %v3962_v3  ;;  %3639 = vmatpush3.msra.mxu1 %v4141_v50  ;;  %v2362_v50 = vld [vmem:[#allocation5 + $0x100] sm:$0xff] }
 0x430   :  { %3560 = vmatmul.mubr.f32.vlgmr.msra.gmra.mxu0 %v4338_v4  ;;  %3597 = vmatprep.subr.mxu0 %v3962_v3  ;;  %v4464_v58 = vand.u32 4294901760, %v2362_v50 }
 0x431   :  { %3640 = vmatprep.subr.mxu1 %v3962_v3  ;;  %3598 = vmatpush3.msra.mxu0 %v1802_v53  ;;  %v4452_v53 = vsub.f32 %v2365_v33, %v4437_v41  ;;  %v4571_v33 = vand.u32 4294901760, %v2354_v45 }
 0x432   :  { %3641 = vmatpush3.msra.mxu1 %v4185_v49  ;;  %3599 = vmatprep.subr.mxu0 %v3962_v3  ;;  %v4473_v49 = vsub.f32 %v2363_v44, %v4454_v54  ;;  %v2352_v44 = vld [vmem:[#allocation5 + $0xb0] sm:$0xff] }
 0x433   :  { %3642 = vmatprep.subr.mxu1 %v3962_v3  ;;  %3600 = vmatpush3.msra.mxu0 %v1809_v57  ;;  %v4462_v57 = vsub.f32 %v2364_v35, %v4444_v47 }
 0x434   :  { %3643 = vmatpush3.msra.mxu1 %v4190_v11  ;;  %3601 = vmatprep.subr.mxu0 %v3962_v3 }
 0x435   :  { %3644 = vmatprep.subr.mxu1 %v3962_v3  ;;  %3602 = vmatpush3.msra.mxu0 %v1816_v62  ;;  %v2361_v62 = vld [vmem:[#allocation5 + $0xf8] sm:$0xff] }
 0x436   :  { %3645 = vmatpush3.msra.mxu1 %v4198_v15  ;;  %3603 = vmatprep.subr.mxu0 %v3962_v3  ;;  %v4477_v11 = vand.u32 4294901760, %v2361_v62  ;;  %v2467_v15 = vand.u32 4294901760, %v4462_v57 }
 0x437   :  { %3646 = vmatprep.subr.mxu1 %v3962_v3  ;;  %3604 = vmatpush3.msra.mxu0 %v1823_v1  ;;  %v2460_v1 = vand.u32 4294901760, %v4452_v53 }
 0x438   :  { %3647 = vmatpush3.msra.mxu1 %v4209_v20  ;;  %3605 = vmatprep.subr.mxu0 %v3962_v3  ;;  %v2358_v20 = vld [vmem:[#allocation5 + $0xe0] sm:$0xff] }
 0x439   :  { %3648 = vmatprep.subr.mxu1 %v3962_v3  ;;  %3606 = vmatpush3.msra.mxu0 %v1830_v13  ;;  %v2359_v13 = vld [vmem:[#allocation5 + $0xe8] sm:$0xff]  ;;  %v2461_v25 = vsub.f32 %v4452_v53, %v2460_v1 }
 0x43a   :  { %3649 = vmatpush3.msra.mxu1 %v4221_v26  ;;  %3607 = vmatprep.subr.mxu0 %v3962_v3  ;;  %v2474_v26 = vand.u32 4294901760, %v4473_v49 }
 0x43b   :  { %3650 = vmatprep.subr.mxu1 %v3962_v3  ;;  %3608 = vmatpush3.msra.mxu0 %v1837_v18  ;;  %v4484_v18 = vsub.f32 %v2362_v50, %v4464_v58 }
 0x43c   :  { %3651 = vmatpush3.msra.mxu1 %v4228_v31  ;;  %3609 = vmatprep.subr.mxu0 %v3962_v3  ;;  %v4502_v31 = vsub.f32 %v2361_v62, %v4477_v11  ;;  %v2475_v29 = vsub.f32 %v4473_v49, %v2474_v26 }
 0x43d   :  { %3652 = vmatprep.subr.mxu1 %v3962_v3  ;;  %3610 = vmatpush3.msra.mxu0 %v1844_v24  ;;  %v4877_v24 = vand.u32 4294901760, %v4239_v38  ;;  %v2468_v38 = vsub.f32 %v4462_v57, %v2467_v15 }
 0x43e   :  { %3653 = vmatpush3.msra.mxu1 %v4241_v39  ;;  %3611 = vmatprep.subr.mxu0 %v3962_v3  ;;  %v2481_v39 = vand.u32 4294901760, %v4484_v18  ;;  %v2476_v34 = vand.u32 4294901760, %v2475_v29 }
 0x43f   :  { %3654 = vmatprep.subr.mxu1 %v3962_v3  ;;  %3612 = vmatpush3.msra.mxu0 %v1851_v30  ;;  %v4497_v30 = vand.u32 4294901760, %v2359_v13  ;;  %v2469_v61 = vand.u32 4294901760, %v2468_v38 }
 0x440   :  { %3655 = vmatpush3.msra.mxu1 %v4251_v52  ;;  %3613 = vmatprep.subr.mxu0 %v3962_v3  ;;  %v4511_v52 = vand.u32 4294901760, %v2358_v20  ;;  %v2482_v46 = vsub.f32 %v4484_v18, %v2481_v39 }
 0x441   :  { %3656 = vmatprep.subr.mxu1 %v3962_v3  ;;  %3614 = vmatpush3.msra.mxu0 %v4876_v14  ;;  %v4525_v36 = vsub.f32 %v2359_v13, %v4497_v30  ;;  %v4584_v13 = vand.u32 4294901760, %v2353_v5 }
 0x442   :  { %3657 = vmatpush3.msra.mxu1 %v4266_v63  ;;  %3615 = vmatprep.subr.mxu0 %v3962_v3  ;;  %v2357_v63 = vld [vmem:[#allocation5 + $0xd8] sm:$0xff]  ;;  %v4539_v9 = vsub.f32 %v2358_v20, %v4511_v52  ;;  %v2483_v2 = vand.u32 4294901760, %v2482_v46  ;;  %v2351_v20 = vld [vmem:[#allocation5 + $0xa8] sm:$0xff] }
 0x443   :  { %3658 = vmatprep.subr.mxu1 %v3962_v3  ;;  %3616 = vmatpush3.msra.mxu0 %v4877_v24  ;;  %v4531_v8 = vand.u32 4294901760, %v2357_v63  ;;  %v2502_v43 = vand.u32 4294901760, %v4525_v36  ;;  %v2523_v24 = vand.u32 4294901760, %v4569_v48  ;;  %v4609_v29 = vand.u32 4294901760, %v2351_v20 }
 0x444   :  { %3659 = vmatpush3.msra.mxu1 %v4279_v7  ;;  %3617 = vmatprep.subr.mxu0 %v3962_v3  ;;  %v2462_v7 = vand.u32 4294901760, %v2461_v25  ;;  %v2509_v4 = vand.u32 4294901760, %v4539_v9  ;;  %v4595_v25 = vsub.f32 %v2354_v45, %v4571_v33 }
 0x445   :  { %3660 = vmatprep.subr.mxu1 %v3962_v3  ;;  %3618 = vmatpush3.msra.mxu0 %v4878_v32  ;;  %v4556_v59 = vsub.f32 %v2357_v63, %v4531_v8  ;;  %v2503_v35 = vsub.f32 %v4525_v36, %v2502_v43  ;;  %v4597_v32 = vand.u32 4294901760, %v2352_v44  ;;  %v2350_v63 = vld [vmem:[#allocation5 + $0xa0] sm:$0xff] }
 0x446   :  { %3661 = vmatpush3.msra.mxu1 %v4287_v16  ;;  %3619 = vmatprep.subr.mxu0 %v3962_v3  ;;  %v2488_v16 = vand.u32 4294901760, %v4502_v31  ;;  %v2510_v14 = vsub.f32 %v4539_v9, %v2509_v4  ;;  %v2537_v46 = vand.u32 4294901760, %v4595_v25 }
 0x447   :  { %3662 = vmatprep.subr.mxu1 %v3962_v3  ;;  %3620 = vmatpush3.msra.mxu0 %v4879_v51  ;;  %v2516_v62 = vand.u32 4294901760, %v4556_v59  ;;  %v2504_v38 = vand.u32 4294901760, %v2503_v35 }
 0x448   :  { %3663 = vmatpush3.msra.mxu1 %v4301_v28  ;;  %3664 = vmatprep.mubr.msk.f32.mxu1 %vm3963_vm2, %v3962_v3  ;;  %v2355_v28 = vld [vmem:[#allocation5 + $0xc8] sm:$0xff]  ;;  %v2489_v40 = vsub.f32 %v4502_v31, %v2488_v16  ;;  %v2511_v55 = vand.u32 4294901760, %v2510_v14 }
 0x449   :  { %3621 = vmatprep.subr.mxu0 %v3962_v3  ;;  %3665 = vmatmul.mubr.f32.vlgmr.msra.gmra.mxu1 %v4335_v42  ;;  %v4558_v0 = vand.u32 4294901760, %v2355_v28 }
 0x44a   :  { %3702 = vmatprep.subr.mxu1 %v3962_v3  ;;  %3622 = vmatpush3.msra.mxu0 %v4880_v21  ;;  %v2490_v50 = vand.u32 4294901760, %v2489_v40  ;;  %v4621_v21 = vand.u32 4294901760, %v2350_v63  ;;  %v4631_v40 = vsub.f32 %v2351_v20, %v4609_v29 }
 0x44b   :  { %3703 = vmatpush3.msra.mxu1 %v2462_v7  ;;  %3623 = vmatprep.subr.mxu0 %v3962_v3  ;;  %v4582_v10 = vsub.f32 %v2355_v28, %v4558_v0  ;;  %v4607_v7 = vsub.f32 %v2353_v5, %v4584_v13  ;;  %v4619_v28 = vsub.f32 %v2352_v44, %v4597_v32 }
 0x44c   :  { %3704 = vmatprep.subr.mxu1 %v3962_v3  ;;  %3624 = vmatpush3.msra.mxu0 %v4881_v56  ;;  %v2538_v5 = vsub.f32 %v4595_v25, %v2537_v46  ;;  %v4641_v60 = vsub.f32 %v2350_v63, %v4621_v21  ;;  %v4666_v63 = vand.u32 4294901760, %v4333_v12 }
 0x44d   :  { %3705 = vmatpush3.msra.mxu1 %v2469_v61  ;;  %3625 = vmatprep.subr.mxu0 %v3962_v3  ;;  %v2530_v51 = vand.u32 4294901760, %v4582_v10  ;;  %v2524_v61 = vsub.f32 %v4569_v48, %v2523_v24  ;;  %v2544_v56 = vand.u32 4294901760, %v4607_v7 }
 0x44e   :  { %3706 = vmatprep.subr.mxu1 %v3962_v3  ;;  %3626 = vmatpush3.msra.mxu0 %v4882_v17  ;;  %v2551_v17 = vand.u32 4294901760, %v4619_v28  ;;  %v2565_v20 = vand.u32 4294901760, %v4641_v60 }
 0x44f   :  { %3707 = vmatpush3.msra.mxu1 %v2476_v34  ;;  %3627 = vmatprep.subr.mxu0 %v3962_v3  ;;  %v2531_v45 = vsub.f32 %v4582_v10, %v2530_v51  ;;  %v2545_v44 = vsub.f32 %v4607_v7, %v2544_v56 }
 0x450   :  { %3708 = vmatprep.subr.mxu1 %v3962_v3  ;;  %3628 = vmatpush3.msra.mxu0 %v4883_v27  ;;  %v2558_v27 = vand.u32 4294901760, %v4631_v40  ;;  %v2552_v14 = vsub.f32 %v4619_v28, %v2551_v17 }
 0x451   :  { %3629 = vmatprep.mubr.msk.f32.mxu0 %vm3963_vm2, %v3962_v3  ;;  %3709 = vmatpush3.msra.mxu1 %v2483_v2  ;;  %v2525_v2 = vand.u32 4294901760, %v2524_v61  ;;  %v2532_v35 = vand.u32 4294901760, %v2531_v45 }
 0x452   :  { %3630 = vmatmul.mubr.f32.vlgmr.msra.gmra.mxu0 %v4335_v42  ;;  %3667 = vmatprep.subr.mxu0 %v3962_v3  ;;  %v2517_v42 = vsub.f32 %v4556_v59, %v2516_v62 }
 0x453   :  { %3710 = vmatprep.subr.mxu1 %v3962_v3  ;;  %3668 = vmatpush3.msra.mxu0 %v4437_v41 }
 0x454   :  { %3711 = vmatpush3.msra.mxu1 %v2490_v50  ;;  %3669 = vmatprep.subr.mxu0 %v3962_v3  ;;  %v2518_v34 = vand.u32 4294901760, %v2517_v42  ;;  %v2539_v50 = vand.u32 4294901760, %v2538_v5  ;;  %v2553_v42 = vand.u32 4294901760, %v2552_v14 }
 0x455   :  { %3712 = vmatprep.subr.mxu1 %v3962_v3  ;;  %3670 = vmatpush3.msra.mxu0 %v4444_v47 }
 0x456   :  { %3713 = vmatpush3.msra.mxu1 %v2497_v37  ;;  %3671 = vmatprep.subr.mxu0 %v3962_v3  ;;  %v2546_v37 = vand.u32 4294901760, %v2545_v44 }
 0x457   :  { %3714 = vmatprep.subr.mxu1 %v3962_v3  ;;  %3672 = vmatpush3.msra.mxu0 %v4454_v54 }
 0x458   :  { %3715 = vmatpush3.msra.mxu1 %v2504_v38  ;;  %3673 = vmatprep.subr.mxu0 %v3962_v3  ;;  %v2559_v38 = vsub.f32 %v4631_v40, %v2558_v27 }
 0x459   :  { %3716 = vmatprep.subr.mxu1 %v3962_v3  ;;  %3674 = vmatpush3.msra.mxu0 %v4464_v58 }
 0x45a   :  { %3717 = vmatpush3.msra.mxu1 %v2511_v55  ;;  %3675 = vmatprep.subr.mxu0 %v3962_v3  ;;  %v2566_v55 = vsub.f32 %v4641_v60, %v2565_v20  ;;  %v2560_v61 = vand.u32 4294901760, %v2559_v38 }
 0x45b   :  { %3718 = vmatprep.subr.mxu1 %v3962_v3  ;;  %3676 = vmatpush3.msra.mxu0 %v4477_v11 }
 0x45c   :  { %3719 = vmatpush3.msra.mxu1 %v2518_v34  ;;  %3677 = vmatprep.subr.mxu0 %v3962_v3  ;;  %v4679_v34 = vsub.f32 %v4333_v12, %v4666_v63  ;;  %v2567_v45 = vand.u32 4294901760, %v2566_v55 }
 0x45d   :  { %3720 = vmatprep.subr.mxu1 %v3962_v3  ;;  %3678 = vmatpush3.msra.mxu0 %v4488_v19 }
 0x45e   :  { %3721 = vmatpush3.msra.mxu1 %v2525_v2  ;;  %3679 = vmatprep.subr.mxu0 %v3962_v3  ;;  %v2449_v2 = vand.u32 4294901760, %v4679_v34 }
 0x45f   :  { %3722 = vmatprep.subr.mxu1 %v3962_v3  ;;  %3680 = vmatpush3.msra.mxu0 %v4497_v30 }
 0x460   :  { %3723 = vmatpush3.msra.mxu1 %v2532_v35  ;;  %3681 = vmatprep.subr.mxu0 %v3962_v3  ;;  %v2450_v12 = vsub.f32 %v4679_v34, %v2449_v2 }
 0x461   :  { %3724 = vmatprep.subr.mxu1 %v3962_v3  ;;  %3682 = vmatpush3.msra.mxu0 %v4511_v52 }
 0x462   :  { %3725 = vmatpush3.msra.mxu1 %v2539_v50  ;;  %3683 = vmatprep.subr.mxu0 %v3962_v3  ;;  %v2451_v5 = vand.u32 4294901760, %v2450_v12 }
 0x463   :  { %3726 = vmatprep.subr.mxu1 %v3962_v3  ;;  %3684 = vmatpush3.msra.mxu0 %v4531_v8 }
 0x464   :  { %3727 = vmatpush3.msra.mxu1 %v2546_v37  ;;  %3685 = vmatprep.subr.mxu0 %v3962_v3 }
 0x465   :  { %3728 = vmatprep.subr.mxu1 %v3962_v3  ;;  %3686 = vmatpush3.msra.mxu0 %v4545_v23 }
 0x466   :  { %3729 = vmatpush3.msra.mxu1 %v2553_v42  ;;  %3687 = vmatprep.subr.mxu0 %v3962_v3 }
 0x467   :  { %3730 = vmatprep.subr.mxu1 %v3962_v3  ;;  %3688 = vmatpush3.msra.mxu0 %v4558_v0 }
 0x468   :  { %3731 = vmatpush3.msra.mxu1 %v2560_v61  ;;  %3689 = vmatprep.subr.mxu0 %v3962_v3 }
 0x469   :  { %3732 = vmatprep.subr.mxu1 %v3962_v3  ;;  %3690 = vmatpush3.msra.mxu0 %v4571_v33 }
 0x46a   :  { %3733 = vmatpush3.msra.mxu1 %v2567_v45  ;;  %3734 = vmatprep.mubr.msk.f32.mxu1 %vm3963_vm2, %v3962_v3 }
 0x46b   :  { %3691 = vmatprep.subr.mxu0 %v3962_v3  ;;  %3735 = vmatmul.mubr.f32.vlgmr.msra.gmra.mxu1 %v4666_v63 }
 0x46c   :  { %3772 = vmatprep.subr.mxu1 %v3962_v3  ;;  %3692 = vmatpush3.msra.mxu0 %v4584_v13 }
 0x46d   :  { %3773 = vmatpush3.msra.mxu1 %v4437_v41  ;;  %3693 = vmatprep.subr.mxu0 %v3962_v3 }
 0x46e   :  { %3774 = vmatprep.subr.mxu1 %v3962_v3  ;;  %3694 = vmatpush3.msra.mxu0 %v4597_v32 }
 0x46f   :  { %3775 = vmatpush3.msra.mxu1 %v4444_v47  ;;  %3695 = vmatprep.subr.mxu0 %v3962_v3 }
 0x470   :  { %3776 = vmatprep.subr.mxu1 %v3962_v3  ;;  %3696 = vmatpush3.msra.mxu0 %v4609_v29 }
 0x471   :  { %3777 = vmatpush3.msra.mxu1 %v4454_v54  ;;  %3697 = vmatprep.subr.mxu0 %v3962_v3 }
 0x472   :  { %3778 = vmatprep.subr.mxu1 %v3962_v3  ;;  %3698 = vmatpush3.msra.mxu0 %v4621_v21 }
 0x473   :  { %3699 = vmatprep.mubr.msk.f32.mxu0 %vm3963_vm2, %v3962_v3  ;;  %3779 = vmatpush3.msra.mxu1 %v4464_v58 }
 0x474   :  { %3700 = vmatmul.mubr.f32.vlgmr.msra.gmra.mxu0 %v2451_v5  ;;  %3737 = vmatprep.subr.mxu0 %v3962_v3 }
 0x475   :  { %3780 = vmatprep.subr.mxu1 %v3962_v3  ;;  %3738 = vmatpush3.msra.mxu0 %v4452_v53 }
 0x476   :  { %3781 = vmatpush3.msra.mxu1 %v4477_v11  ;;  %3739 = vmatprep.subr.mxu0 %v3962_v3 }
 0x477   :  { %3782 = vmatprep.subr.mxu1 %v3962_v3  ;;  %3740 = vmatpush3.msra.mxu0 %v4462_v57 }
 0x478   :  { %3783 = vmatpush3.msra.mxu1 %v4488_v19  ;;  %3741 = vmatprep.subr.mxu0 %v3962_v3 }
 0x479   :  { %3784 = vmatprep.subr.mxu1 %v3962_v3  ;;  %3742 = vmatpush3.msra.mxu0 %v4473_v49 }
 0x47a   :  { %3785 = vmatpush3.msra.mxu1 %v4497_v30  ;;  %3743 = vmatprep.subr.mxu0 %v3962_v3 }
 0x47b   :  { %3786 = vmatprep.subr.mxu1 %v3962_v3  ;;  %3744 = vmatpush3.msra.mxu0 %v4484_v18 }
 0x47c   :  { %3787 = vmatpush3.msra.mxu1 %v4511_v52  ;;  %3745 = vmatprep.subr.mxu0 %v3962_v3 }
 0x47d   :  { %3788 = vmatprep.subr.mxu1 %v3962_v3  ;;  %3746 = vmatpush3.msra.mxu0 %v4502_v31 }
 0x47e   :  { %3789 = vmatpush3.msra.mxu1 %v4531_v8  ;;  %3747 = vmatprep.subr.mxu0 %v3962_v3 }
 0x47f   :  { %3790 = vmatprep.subr.mxu1 %v3962_v3  ;;  %3748 = vmatpush3.msra.mxu0 %v4516_v6 }
 0x480   :  { %3791 = vmatpush3.msra.mxu1 %v4545_v23  ;;  %3749 = vmatprep.subr.mxu0 %v3962_v3 }
 0x481   :  { %3792 = vmatprep.subr.mxu1 %v3962_v3  ;;  %3750 = vmatpush3.msra.mxu0 %v4525_v36 }
 0x482   :  { %3793 = vmatpush3.msra.mxu1 %v4558_v0  ;;  %3751 = vmatprep.subr.mxu0 %v3962_v3 }
 0x483   :  { %3794 = vmatprep.subr.mxu1 %v3962_v3  ;;  %3752 = vmatpush3.msra.mxu0 %v4539_v9 }
 0x484   :  { %3795 = vmatpush3.msra.mxu1 %v4571_v33  ;;  %3753 = vmatprep.subr.mxu0 %v3962_v3 }
 0x485   :  { %3796 = vmatprep.subr.mxu1 %v3962_v3  ;;  %3754 = vmatpush3.msra.mxu0 %v4556_v59 }
 0x486   :  { %3797 = vmatpush3.msra.mxu1 %v4584_v13  ;;  %3755 = vmatprep.subr.mxu0 %v3962_v3 }
 0x487   :  { %3798 = vmatprep.subr.mxu1 %v3962_v3  ;;  %3756 = vmatpush3.msra.mxu0 %v4569_v48 }
 0x488   :  { %3799 = vmatpush3.msra.mxu1 %v4597_v32  ;;  %3757 = vmatprep.subr.mxu0 %v3962_v3 }
 0x489   :  { %3800 = vmatprep.subr.mxu1 %v3962_v3  ;;  %3758 = vmatpush3.msra.mxu0 %v4582_v10 }
 0x48a   :  { %3801 = vmatpush3.msra.mxu1 %v4609_v29  ;;  %3759 = vmatprep.subr.mxu0 %v3962_v3 }
 0x48b   :  { %3802 = vmatprep.subr.mxu1 %v3962_v3  ;;  %3760 = vmatpush3.msra.mxu0 %v4595_v25 }
 0x48c   :  { %3803 = vmatpush3.msra.mxu1 %v4621_v21  ;;  %3804 = vmatprep.mubr.msk.f32.mxu1 %vm3963_vm2, %v3962_v3 }
 0x48d   :  { %3761 = vmatprep.subr.mxu0 %v3962_v3  ;;  %3805 = vmatmul.mubr.f32.vlgmr.msra.gmra.mxu1 %v2449_v2 }
 0x48e   :  { %3842 = vmatprep.subr.mxu1 %v3962_v3  ;;  %3762 = vmatpush3.msra.mxu0 %v4607_v7 }
 0x48f   :  { %3843 = vmatpush3.msra.mxu1 %v4437_v41  ;;  %3763 = vmatprep.subr.mxu0 %v3962_v3 }
 0x490   :  { %3844 = vmatprep.subr.mxu1 %v3962_v3  ;;  %3764 = vmatpush3.msra.mxu0 %v4619_v28 }
 0x491   :  { %3845 = vmatpush3.msra.mxu1 %v4444_v47  ;;  %3765 = vmatprep.subr.mxu0 %v3962_v3 }
 0x492   :  { %3846 = vmatprep.subr.mxu1 %v3962_v3  ;;  %3766 = vmatpush3.msra.mxu0 %v4631_v40 }
 0x493   :  { %3847 = vmatpush3.msra.mxu1 %v4454_v54  ;;  %3767 = vmatprep.subr.mxu0 %v3962_v3 }
 0x494   :  { %3848 = vmatprep.subr.mxu1 %v3962_v3  ;;  %3768 = vmatpush3.msra.mxu0 %v4641_v60 }
 0x495   :  { %3769 = vmatprep.mubr.msk.f32.mxu0 %vm3963_vm2, %v3962_v3  ;;  %3849 = vmatpush3.msra.mxu1 %v4464_v58 }
 0x496   :  { %3770 = vmatmul.mubr.f32.vlgmr.msra.gmra.mxu0 %v4679_v34  ;;  %3807 = vmatprep.subr.mxu0 %v3962_v3 }
 0x497   :  { %3850 = vmatprep.subr.mxu1 %v3962_v3  ;;  %3808 = vmatpush3.msra.mxu0 %v2460_v1 }
 0x498   :  { %3851 = vmatpush3.msra.mxu1 %v4477_v11  ;;  %3809 = vmatprep.subr.mxu0 %v3962_v3 }
 0x499   :  { %3852 = vmatprep.subr.mxu1 %v3962_v3  ;;  %3810 = vmatpush3.msra.mxu0 %v2467_v15 }
 0x49a   :  { %3853 = vmatpush3.msra.mxu1 %v4488_v19  ;;  %3811 = vmatprep.subr.mxu0 %v3962_v3 }
 0x49b   :  { %3854 = vmatprep.subr.mxu1 %v3962_v3  ;;  %3812 = vmatpush3.msra.mxu0 %v2474_v26 }
 0x49c   :  { %3855 = vmatpush3.msra.mxu1 %v4497_v30  ;;  %3813 = vmatprep.subr.mxu0 %v3962_v3 }
 0x49d   :  { %3856 = vmatprep.subr.mxu1 %v3962_v3  ;;  %3814 = vmatpush3.msra.mxu0 %v2481_v39 }
 0x49e   :  { %3857 = vmatpush3.msra.mxu1 %v4511_v52  ;;  %3815 = vmatprep.subr.mxu0 %v3962_v3 }
 0x49f   :  { %3858 = vmatprep.subr.mxu1 %v3962_v3  ;;  %3816 = vmatpush3.msra.mxu0 %v2488_v16 }
 0x4a0   :  { %3859 = vmatpush3.msra.mxu1 %v4531_v8  ;;  %3817 = vmatprep.subr.mxu0 %v3962_v3 }
 0x4a1   :  { %3860 = vmatprep.subr.mxu1 %v3962_v3  ;;  %3818 = vmatpush3.msra.mxu0 %v2495_v22 }
 0x4a2   :  { %3861 = vmatpush3.msra.mxu1 %v4545_v23  ;;  %3819 = vmatprep.subr.mxu0 %v3962_v3 }
 0x4a3   :  { %3862 = vmatprep.subr.mxu1 %v3962_v3  ;;  %3820 = vmatpush3.msra.mxu0 %v2502_v43 }
 0x4a4   :  { %3863 = vmatpush3.msra.mxu1 %v4558_v0  ;;  %3821 = vmatprep.subr.mxu0 %v3962_v3 }
 0x4a5   :  { %3864 = vmatprep.subr.mxu1 %v3962_v3  ;;  %3822 = vmatpush3.msra.mxu0 %v2509_v4 }
 0x4a6   :  { %3865 = vmatpush3.msra.mxu1 %v4571_v33  ;;  %3823 = vmatprep.subr.mxu0 %v3962_v3  ;;  %v1691_v33 = vld [vmem:[#allocation5 + $0x120] sm:$0xff] }
 0x4a7   :  { %3866 = vmatprep.subr.mxu1 %v3962_v3  ;;  %3824 = vmatpush3.msra.mxu0 %v2516_v62 }
 0x4a8   :  { %3867 = vmatpush3.msra.mxu1 %v4584_v13  ;;  %3825 = vmatprep.subr.mxu0 %v3962_v3 }
 0x4a9   :  { %3868 = vmatprep.subr.mxu1 %v3962_v3  ;;  %3826 = vmatpush3.msra.mxu0 %v2523_v24 }
 0x4aa   :  { %3869 = vmatpush3.msra.mxu1 %v4597_v32  ;;  %3827 = vmatprep.subr.mxu0 %v3962_v3 }
 0x4ab   :  { %3870 = vmatprep.subr.mxu1 %v3962_v3  ;;  %3828 = vmatpush3.msra.mxu0 %v2530_v51 }
 0x4ac   :  { %3871 = vmatpush3.msra.mxu1 %v4609_v29  ;;  %3829 = vmatprep.subr.mxu0 %v3962_v3 }
 0x4ad   :  { %3872 = vmatprep.subr.mxu1 %v3962_v3  ;;  %3830 = vmatpush3.msra.mxu0 %v2537_v46 }
 0x4ae   :  { %3873 = vmatpush3.msra.mxu1 %v4621_v21  ;;  %3874 = vmatprep.mubr.msk.f32.mxu1 %vm3963_vm2, %v3962_v3 }
 0x4af   :  { %3831 = vmatprep.subr.mxu0 %v3962_v3  ;;  %3875 = vmatmul.mubr.f32.vlgmr.msra.gmra.mxu1 %v4666_v63 }
 0x4b0   :  { %3832 = vmatpush3.msra.mxu0 %v2544_v56  ;;  %3839 = vmatprep.mubr.msk.f32.mxu0 %vm3963_vm2, %v3962_v3 }
 0x4b1   :  { %3833 = vmatprep.subr.mxu0 %v3962_v3 }
 0x4b2   :  { %3834 = vmatpush3.msra.mxu0 %v2551_v17 }
 0x4b3   :  { %3835 = vmatprep.subr.mxu0 %v3962_v3 }
 0x4b4   :  { %3836 = vmatpush3.msra.mxu0 %v2558_v27 }
 0x4b5   :  { %3837 = vmatprep.subr.mxu0 %v3962_v3 }
 0x4b6   :  { %3838 = vmatpush3.msra.mxu0 %v2565_v20 }
 0x4b7   :  { %3840 = vmatmul.mubr.f32.vlgmr.msra.gmra.mxu0 %v4666_v63 }
 0x4c7   :  { %v1946_v41 = vpop.f32.mrf.mxu1 }
 0x4c9   :  { %v3526_v47 = vpop.f32.mrf.mxu1 }
 0x4cf   :  { %v1795_v53 = vpop.f32.mrf.mxu0 }
 0x4d0   :  { %v1947_v54 = vadd.f32 %v1946_v41, %v1795_v53 }
 0x4d1   :  { %v3491_v57 = vpop.f32.mrf.mxu0 }
 0x4e7   :  { %v2139_v58 = vpop.f32.mrf.mxu1 }
 0x4e9   :  { %v3596_v1 = vpop.f32.mrf.mxu1 }
 0x4f0   :  { %v2050_v49 = vpop.f32.mrf.mxu0 }
 0x4f1   :  { %v2051_v11 = vadd.f32 %v2050_v49, %v1947_v54 }
 0x4f2   :  { %v3561_v15 = vpop.f32.mrf.mxu0 }
 0x4f3   :  { %v2140_v18 = vadd.f32 %v2139_v58, %v2051_v11 }
 0x509   :  { %v2345_v19 = vpop.f32.mrf.mxu1 }
 0x50b   :  { %v3666_v26 = vpop.f32.mrf.mxu1 }
 0x512   :  { %v2258_v30 = vpop.f32.mrf.mxu0 }
 0x513   :  { %v2259_v3 = vadd.f32 %v2258_v30, %v2140_v18 }
 0x514   :  { %v3631_v31 = vpop.f32.mrf.mxu0 }
 0x515   :  { %v2346_v39 = vadd.f32 %v2345_v19, %v2259_v3 }
 0x517   :  { %v2349_v24 = vadd.f32 %v2346_v39, %v1691_v33 }
 0x52b   :  { %v2604_v52 = vpop.f32.mrf.mxu1 }
 0x52d   :  { %v3736_v6 = vpop.f32.mrf.mxu1 }
 0x534   :  { %v2453_v36 = vpop.f32.mrf.mxu0 }
 0x535   :  { %v2605_v59 = vadd.f32 %v2604_v52, %v2453_v36 }
 0x536   :  { %v3701_v16 = vpop.f32.mrf.mxu0 }
 0x54d   :  { %v2797_v8 = vpop.f32.mrf.mxu1 }
 0x54f   :  { %v3806_v9 = vpop.f32.mrf.mxu1 }
 0x556   :  { %v2708_v22 = vpop.f32.mrf.mxu0 }
 0x557   :  { %v2709_v4 = vadd.f32 %v2708_v22, %v2605_v59 }
 0x558   :  { %v3771_v23 = vpop.f32.mrf.mxu0 }
 0x559   :  { %v2798_v48 = vadd.f32 %v2797_v8, %v2709_v4 }
 0x56f   :  { %v3003_v43 = vpop.f32.mrf.mxu1 }
 0x571   :  { %v3876_v0 = vpop.f32.mrf.mxu1 }
 0x577   :  { %v2916_v62 = vpop.f32.mrf.mxu0 }
 0x578   :  { %v2917_v10 = vadd.f32 %v2916_v62, %v2798_v48 }
 0x579   :  { %v3841_v13 = vpop.f32.mrf.mxu0 }
 0x57a   :  { %v3004_v25 = vadd.f32 %v3003_v43, %v2917_v10 }
 0x57c   :  { %v3007_v32 = vadd.f32 %v3004_v25, %v2349_v24 }
 0x57e   :  { %3008 = vst [vmem:[#allocation7] sm:$0xff] %v3007_v32 }
 0x57f   :  { %3943 = shalt.err (!%p3940_p0)
}
 0x580   :  { %3018 = dma.vmem_to_hbm [thread:$0]  %s3016_s26, 128, %s4867_s3, [#allocation4]  }
 0x581   :  { %3956 = dma.done.wait [#allocation4], 128  }
 0x582   :  { %3957 = vsyncadd [#allocation4], 4294967168 }
 0x583   :  { %3022 = vsyncpa [#allocation3], 1 }
 0x584   :  { %3023 = vsyncpa [#allocation6], 1 }
 0x585   :  { %3024 = vsyncpa [#allocation4], 1 }

</bundles_post_ra>
